<compile_context>
chip_gen: v7x
topology: tpu7x:2x2x1
jax: 0.10.0
libtpu: 0.0.40
codegen_flags: <defaults>
</compile_context>

<pallas_src>
import jax
import jax.numpy as jnp
from jax import lax
from jax.experimental import pallas as pl
from jax.experimental.pallas import tpu as pltpu


# ----------------------------------------------------------------------------
# Fused kernel: 3x3 conv (single im2col matmul) + bias + ReLU + GAP + linear
# ----------------------------------------------------------------------------
def _fused_encoder_head_kernel(x_ref, w_ref, b_ref, clsw_ref, clsb_ref,
                               feat_ref, logits_ref, xp_sc, feat_sc):
    # x_ref:      [TB, H, W, C_in]        bf16  (UNPADDED NHWC input tile)
    # w_ref:      [9*C_in, C_out]         bf16  (im2col weight, (di,dj,c_in) major)
    # b_ref:      [1, C_out]              f32
    # clsw_ref:   [C_out, NUM_CLASS]      f32   (pre-scaled by 1/(H*W))
    # clsb_ref:   [1, NUM_CLASS]          f32
    # feat_ref:   [TB, C_out, H*W]        f32   (lane-dense, NCHW-flat)
    # logits_ref: [TB, 1, NUM_CLASS]      f32
    # xp_sc:      [TB, H+2, W+2, C_in]    bf16  VMEM scratch (halo buffer)
    # feat_sc:    [TB, H*W, C_out]        f32   VMEM scratch (feature tile)
    TB, H, W, C_in = x_ref.shape
    C_out = feat_ref.shape[1]
    num_class = logits_ref.shape[-1]
    HW = H * W

    # ---- halo handled entirely in VMEM (no padded HBM copy of the input).
    # Zero every step: with the "parallel" batch axis each TensorCore owns its
    # own scratch, so gating the zero on program_id==0 would leave one core's
    # borders uninitialized.  The scratch is tiny, so this is cheap.
    xp_sc[...] = jnp.zeros_like(xp_sc)
    xp_sc[:, pl.ds(1, H), pl.ds(1, W), :] = x_ref[...]
    xpv = xp_sc[...]                                   # [TB, H+2, W+2, C_in] bf16

    # ---- in-VMEM im2col: concat the 9 statically shifted windows along the
    # channel axis and run ONE MXU matmul with K = 9*C_in (instead of nine
    # K=C_in matmuls + eight redundant f32 accumulate passes).
    x_cat = jnp.concatenate(
        [xpv[:, di:di + H, dj:dj + W, :]
         for di in range(3) for dj in range(3)], axis=-1)      # [TB, H, W, 9*C_in]
    x_cat = x_cat.reshape(TB * HW, 9 * C_in)

    acc = jnp.dot(x_cat, w_ref[...], preferred_element_type=jnp.float32)
    feat = jnp.maximum(acc + b_ref[...], 0.0)                  # [TB*HW, C_out] f32
    # Park the fp32 feature tile in explicit VMEM scratch: ends the
    # accumulator's live range and bounds vreg pressure at larger TB.
    feat_sc[...] = feat.reshape(TB, HW, C_out)

    # ---- per-item epilogue: lane-dense [C_out, HW] store (HW is a multiple of
    # 128 at these shapes -> unmasked vst; the wrapper's NCHW view is a free
    # reshape) + GAP partial sums.  Static unroll over a small TB.
    pooled_rows = []
    for b in range(TB):
        fb = feat_sc[b]                                        # [HW, C_out] f32
        feat_ref[b] = fb.T.astype(feat_ref.dtype)              # [C_out, HW]
        pooled_rows.append(jnp.sum(fb, axis=0, keepdims=True))  # [1, C_out]
    pooled = jnp.concatenate(pooled_rows, axis=0)              # [TB, C_out]

    # fused classifier head on the VMEM-resident features:
    # GAP (the 1/(H*W) factor is folded into clsw) + linear + bias.
    logits = jnp.dot(pooled, clsw_ref[...],
                     preferred_element_type=jnp.float32) + clsb_ref[...]
    logits_ref[...] = logits.reshape(TB, 1, num_class)


def _pick_batch_tile(batch, tb_max=8):
    """Largest divisor of `batch` <= tb_max (no dropped remainder), preferring
    >= 2 grid steps so the 'parallel' batch axis shards across v7x's 2 TCs."""
    divisors = [d for d in range(1, batch + 1) if batch % d == 0 and d <= tb_max]
    tb = max(divisors)
    if batch // tb < 2:
        two_step = [d for d in divisors if batch // d >= 2]
        if two_step:
            tb = max(two_step)
    return tb


def fused_forward(x_nchw, conv_w, conv_b, cls_w, cls_b, tb_max=8):
    """x_nchw [B,C,H,W] f32 -> (features NCHW [B,C_out,H,W] f32, logits [B,num_class] f32)."""
    B, C_in, H, W = x_nchw.shape
    C_out = conv_w.shape[0]
    num_class = cls_w.shape[1]
    HW = H * W

    # ---- input / parameter prep (small, fused into the same jitted XLA program)
    # UNPADDED bf16 NHWC input: halo is built in-kernel, so no padded HBM copy.
    x_nhwc = jnp.transpose(x_nchw, (0, 2, 3, 1)).astype(jnp.bfloat16)
    # conv weight [C_out, C_in, 3, 3] -> [(di, dj, c_in) = 9*C_in, C_out], bf16
    w36 = jnp.transpose(conv_w, (2, 3, 1, 0)).reshape(9 * C_in, C_out)
    w36 = w36.astype(jnp.bfloat16)
    b_row = conv_b.reshape(1, C_out).astype(jnp.float32)
    clsw_scaled = (cls_w / float(HW)).astype(jnp.float32)      # fold GAP mean
    clsb_row = cls_b.reshape(1, num_class).astype(jnp.float32)

    # ---- batch-tiled grid: TB items per step, grid kept >= 2 where possible so
    # "parallel" shards across v7x's 2 TensorCores.  TB divides B exactly.
    TB = _pick_batch_tile(B, tb_max)
    assert B % TB == 0, "batch tile must divide batch (no dropped remainder)"
    grid = (B // TB,)

    feat_flat, logits3 = pl.pallas_call(
        _fused_encoder_head_kernel,
        out_shape=(
            jax.ShapeDtypeStruct((B, C_out, HW), jnp.float32),
            jax.ShapeDtypeStruct((B, 1, num_class), jnp.float32),
        ),
        grid_spec=pltpu.PrefetchScalarGridSpec(
            num_scalar_prefetch=0,
            grid=grid,
            in_specs=[
                pl.BlockSpec((TB, H, W, C_in), lambda i: (i, 0, 0, 0)),
                pl.BlockSpec((9 * C_in, C_out), lambda i: (0, 0)),     # resident
                pl.BlockSpec((1, C_out), lambda i: (0, 0)),            # resident
                pl.BlockSpec((C_out, num_class), lambda i: (0, 0)),    # resident
                pl.BlockSpec((1, num_class), lambda i: (0, 0)),        # resident
            ],
            out_specs=[
                # lane-dense NCHW-flat features: last dim H*W (>=128, dense vst)
                pl.BlockSpec((TB, C_out, HW), lambda i: (i, 0, 0)),
                pl.BlockSpec((TB, 1, num_class), lambda i: (i, 0, 0)),
            ],
            scratch_shapes=[
                pltpu.VMEM((TB, H + 2, W + 2, C_in), jnp.bfloat16),    # halo buf
                pltpu.VMEM((TB, HW, C_out), jnp.float32),              # fp32 feats
            ],
        ),
        compiler_params=pltpu.CompilerParams(
            dimension_semantics=("parallel",),
            # explicit scoped-VMEM limit (v5e default is only 16 MiB); our
            # per-step footprint is a few MiB even at TB=8, well under the
            # v7x 64 MiB physical budget.
            vmem_limit_bytes=32 * 1024 * 1024,
        ),
    )(x_nhwc, w36, b_row, clsw_scaled, clsb_row)

    logits = logits3[:, 0, :]
    # Kernel already emitted NCHW-flat [B, C_out, H*W]: this reshape is free
    # (no extra HBM transpose pass, unlike the previous NHWC output).
    features_nchw = feat_flat.reshape(B, C_out, H, W)
    return features_nchw, logits


# ----------------------------------------------------------------------------
# NetworkTemplate equivalent: data_dic in -> data_dic with 'features'/'logits'
# ----------------------------------------------------------------------------
class NetworkTemplatePallas:
    """Pallas equivalent of NetworkTemplate.forward(data_dic) -> data_dic.

    module_topology = ['encoder', 'head'] is preserved semantically, but both
    modules execute as a single fused Pallas kernel so the encoder's feature
    map never round-trips HBM just to be pooled by the head.
    NOTE: enc_channels=128 (a lane multiple) would make every vreg dense; kept
    at 32 here to match the original synthetic topology."""

    def __init__(self, num_class=10, in_channels=4, enc_channels=32, key=None):
        self.num_class = num_class
        self.module_topology = ['encoder', 'head']   # cfg-driven builder is config plumbing
        key = jax.random.PRNGKey(0) if key is None else key
        k1, k2, k3, k4 = jax.random.split(key, 4)
        # deterministic synthetic parameter init (no checkpoint load)
        self.conv_w = jax.random.normal(
            k1, (enc_channels, in_channels, 3, 3), jnp.float32) * 0.1
        self.conv_b = jax.random.normal(k2, (enc_channels,), jnp.float32) * 0.1
        self.cls_w = jax.random.normal(
            k3, (enc_channels, num_class), jnp.float32) * 0.1
        self.cls_b = jax.random.normal(k4, (num_class,), jnp.float32) * 0.1
        self._fwd = jax.jit(fused_forward)

    def forward(self, data_dic):
        data_dic = dict(data_dic)
        feats, logits = self._fwd(data_dic['image'], self.conv_w, self.conv_b,
                                  self.cls_w, self.cls_b)
        data_dic['features'] = feats    # encoder output (NCHW)
        data_dic['logits'] = logits     # classifier head output
        return data_dic

    __call__ = forward


if __name__ == "__main__":
    key = jax.random.PRNGKey(0)
    x = jax.random.normal(key, (2, 4, 16, 16), jnp.float32)   # NCHW

    net = NetworkTemplatePallas(num_class=10, in_channels=4, enc_channels=32)
    out = net({'image': x})
    feats = jax.block_until_ready(out['features'])
    logits = jax.block_until_ready(out['logits'])

    # Reference: fp32 conv on the same bf16-rounded inputs the kernel sees
    # (kernel accumulates in fp32), bias before ReLU like nn.Conv2d, then
    # GAP + linear in fp32.
    x_bf = x.astype(jnp.bfloat16).astype(jnp.float32)
    w_bf = net.conv_w.astype(jnp.bfloat16).astype(jnp.float32)
    ref_feat = jax.nn.relu(
        lax.conv_general_dilated(
            x_bf, w_bf, window_strides=(1, 1), padding='SAME',
            dimension_numbers=('NCHW', 'OIHW', 'NCHW'),
            precision=lax.Precision.HIGHEST)
        + net.conv_b[None, :, None, None])
    ref_logits = jnp.dot(jnp.mean(ref_feat, axis=(2, 3)), net.cls_w,
                         precision=lax.Precision.HIGHEST) + net.cls_b

    assert feats.shape == (2, 32, 16, 16)
    assert logits.shape == (2, 10)
    assert jnp.allclose(feats, ref_feat, atol=1e-3, rtol=1e-3)
    assert jnp.allclose(logits, ref_logits, atol=1e-3, rtol=1e-3)
    print("KERNEL_OK")
</pallas_src>

<mosaic_0001>
module attributes {stable_mosaic.version = 11 : i64} {
  func.func @_fused_encoder_head_kernel(%arg0: i32, %arg1: memref<1x16x16x4xbf16, #tpu.memory_space<vmem>>, %arg2: memref<36x32xbf16, #tpu.memory_space<vmem>>, %arg3: memref<1x32xf32, #tpu.memory_space<vmem>>, %arg4: memref<32x10xf32, #tpu.memory_space<vmem>>, %arg5: memref<1x10xf32, #tpu.memory_space<vmem>>, %arg6: memref<1x32x256xf32, #tpu.memory_space<vmem>>, %arg7: memref<1x1x10xf32, #tpu.memory_space<vmem>>, %arg8: memref<1x18x18x4xbf16, #tpu.memory_space<vmem>>, %arg9: memref<1x256x32xf32, #tpu.memory_space<vmem>>) attributes {dimension_semantics = [#tpu.dimension_semantics<parallel>], iteration_bounds = array<i64: 2>, scalar_prefetch = 0 : i64, scratch_operands = 2 : i64, tpu.core_type = #tpu.core_type<tc>, window_params = [{transform_indices = @transform_0, window_bounds = array<i64: 1, 16, 16, 4>}, {pipeline_mode = #tpu.pipeline_mode<synchronous>, transform_indices = @transform_1, window_bounds = array<i64: 36, 32>}, {pipeline_mode = #tpu.pipeline_mode<synchronous>, transform_indices = @transform_2, window_bounds = array<i64: 1, 32>}, {pipeline_mode = #tpu.pipeline_mode<synchronous>, transform_indices = @transform_3, window_bounds = array<i64: 32, 10>}, {pipeline_mode = #tpu.pipeline_mode<synchronous>, transform_indices = @transform_4, window_bounds = array<i64: 1, 10>}, {transform_indices = @transform_5, window_bounds = array<i64: 1, 32, 256>}, {transform_indices = @transform_6, window_bounds = array<i64: 1, 1, 10>}]} {
    %cst = arith.constant 0.000000e+00 : bf16
    %0 = vector.broadcast %cst : bf16 to vector<1x18x18x4xbf16>
    %c0 = arith.constant 0 : index
    %c0_0 = arith.constant 0 : index
    %c0_1 = arith.constant 0 : index
    %c0_2 = arith.constant 0 : index
    %1 = vector.load %arg8[%c0, %c0_0, %c0_1, %c0_2] : memref<1x18x18x4xbf16, #tpu.memory_space<vmem>>, vector<1x18x18x4xbf16>
    tpu.vector_store %arg8[%c0, %c0_0, %c0_1, %c0_2], %0 {strides = array<i32>} : memref<1x18x18x4xbf16, #tpu.memory_space<vmem>>, vector<1x18x18x4xbf16>,
    %c0_3 = arith.constant 0 : index
    %c0_4 = arith.constant 0 : index
    %c0_5 = arith.constant 0 : index
    %c0_6 = arith.constant 0 : index
    %2 = vector.load %arg1[%c0_3, %c0_4, %c0_5, %c0_6] : memref<1x16x16x4xbf16, #tpu.memory_space<vmem>>, vector<1x16x16x4xbf16>
    %c0_7 = arith.constant 0 : index
    %c1 = arith.constant 1 : index
    %c1_8 = arith.constant 1 : index
    %c0_9 = arith.constant 0 : index
    %3 = vector.load %arg8[%c0_7, %c1, %c1_8, %c0_9] : memref<1x18x18x4xbf16, #tpu.memory_space<vmem>>, vector<1x16x16x4xbf16>
    tpu.vector_store %arg8[%c0_7, %c1, %c1_8, %c0_9], %2 {strides = array<i32>} : memref<1x18x18x4xbf16, #tpu.memory_space<vmem>>, vector<1x16x16x4xbf16>,
    %c0_10 = arith.constant 0 : index
    %c0_11 = arith.constant 0 : index
    %c0_12 = arith.constant 0 : index
    %c0_13 = arith.constant 0 : index
    %4 = vector.load %arg8[%c0_10, %c0_11, %c0_12, %c0_13] : memref<1x18x18x4xbf16, #tpu.memory_space<vmem>>, vector<1x18x18x4xbf16>
    %5 = vector.extract_strided_slice %4 {offsets = [0, 0, 0, 0], sizes = [1, 16, 16, 4], strides = [1, 1, 1, 1]} : vector<1x18x18x4xbf16> to vector<1x16x16x4xbf16>
    %6 = vector.extract_strided_slice %4 {offsets = [0, 0, 1, 0], sizes = [1, 16, 16, 4], strides = [1, 1, 1, 1]} : vector<1x18x18x4xbf16> to vector<1x16x16x4xbf16>
    %7 = vector.extract_strided_slice %4 {offsets = [0, 0, 2, 0], sizes = [1, 16, 16, 4], strides = [1, 1, 1, 1]} : vector<1x18x18x4xbf16> to vector<1x16x16x4xbf16>
    %8 = vector.extract_strided_slice %4 {offsets = [0, 1, 0, 0], sizes = [1, 16, 16, 4], strides = [1, 1, 1, 1]} : vector<1x18x18x4xbf16> to vector<1x16x16x4xbf16>
    %9 = vector.extract_strided_slice %4 {offsets = [0, 1, 1, 0], sizes = [1, 16, 16, 4], strides = [1, 1, 1, 1]} : vector<1x18x18x4xbf16> to vector<1x16x16x4xbf16>
    %10 = vector.extract_strided_slice %4 {offsets = [0, 1, 2, 0], sizes = [1, 16, 16, 4], strides = [1, 1, 1, 1]} : vector<1x18x18x4xbf16> to vector<1x16x16x4xbf16>
    %11 = vector.extract_strided_slice %4 {offsets = [0, 2, 0, 0], sizes = [1, 16, 16, 4], strides = [1, 1, 1, 1]} : vector<1x18x18x4xbf16> to vector<1x16x16x4xbf16>
    %12 = vector.extract_strided_slice %4 {offsets = [0, 2, 1, 0], sizes = [1, 16, 16, 4], strides = [1, 1, 1, 1]} : vector<1x18x18x4xbf16> to vector<1x16x16x4xbf16>
    %13 = vector.extract_strided_slice %4 {offsets = [0, 2, 2, 0], sizes = [1, 16, 16, 4], strides = [1, 1, 1, 1]} : vector<1x18x18x4xbf16> to vector<1x16x16x4xbf16>
    %14 = tpu.concatenate %5, %6, %7, %8, %9, %10, %11, %12, %13 in 3 : vector<1x16x16x4xbf16>, vector<1x16x16x4xbf16>, vector<1x16x16x4xbf16>, vector<1x16x16x4xbf16>, vector<1x16x16x4xbf16>, vector<1x16x16x4xbf16>, vector<1x16x16x4xbf16>, vector<1x16x16x4xbf16>, vector<1x16x16x4xbf16> -> vector<1x16x16x36xbf16>
    %15 = vector.shape_cast %14 : vector<1x16x16x36xbf16> to vector<256x36xbf16>
    %c0_14 = arith.constant 0 : index
    %c0_15 = arith.constant 0 : index
    %16 = vector.load %arg2[%c0_14, %c0_15] : memref<36x32xbf16, #tpu.memory_space<vmem>>, vector<36x32xbf16>
    %cst_16 = arith.constant dense<0.000000e+00> : vector<256x32xf32>
    %17 = tpu.matmul %15, %16, %cst_16 {dimension_numbers = #tpu.dot_dimension_numbers<[1], [0], [0], [1], [0, 0, 1, 1], [], []>} : vector<256x36xbf16>, vector<36x32xbf16>, vector<256x32xf32> -> vector<256x32xf32>
    %c0_17 = arith.constant 0 : index
    %c0_18 = arith.constant 0 : index
    %18 = vector.load %arg3[%c0_17, %c0_18] : memref<1x32xf32, #tpu.memory_space<vmem>>, vector<1x32xf32>
    %19 = vector.broadcast %18 : vector<1x32xf32> to vector<256x32xf32>
    %20 = arith.addf %17, %19 : vector<256x32xf32>
    %cst_19 = arith.constant 0.000000e+00 : f32
    %21 = vector.broadcast %cst_19 : f32 to vector<256x32xf32>
    %22 = arith.maximumf %20, %21 : vector<256x32xf32>
    %23 = vector.shape_cast %22 : vector<256x32xf32> to vector<1x256x32xf32>
    %c0_20 = arith.constant 0 : index
    %c0_21 = arith.constant 0 : index
    %c0_22 = arith.constant 0 : index
    %24 = vector.load %arg9[%c0_20, %c0_21, %c0_22] : memref<1x256x32xf32, #tpu.memory_space<vmem>>, vector<1x256x32xf32>
    tpu.vector_store %arg9[%c0_20, %c0_21, %c0_22], %23 {strides = array<i32>} : memref<1x256x32xf32, #tpu.memory_space<vmem>>, vector<1x256x32xf32>,
    %c0_23 = arith.constant 0 : index
    %c0_24 = arith.constant 0 : index
    %c0_25 = arith.constant 0 : index
    %25 = vector.load %arg9[%c0_23, %c0_24, %c0_25] : memref<1x256x32xf32, #tpu.memory_space<vmem>>, vector<1x256x32xf32>
    %26 = vector.shape_cast %25 : vector<1x256x32xf32> to vector<256x32xf32>
    %27 = tpu.transpose %26, [1, 0] : vector<256x32xf32> -> vector<32x256xf32>
    %c0_26 = arith.constant 0 : index
    %c0_27 = arith.constant 0 : index
    %c0_28 = arith.constant 0 : index
    %28 = vector.load %arg6[%c0_26, %c0_27, %c0_28] : memref<1x32x256xf32, #tpu.memory_space<vmem>>, vector<1x32x256xf32>
    %29 = vector.shape_cast %28 : vector<1x32x256xf32> to vector<32x256xf32>
    %30 = vector.shape_cast %27 : vector<32x256xf32> to vector<1x32x256xf32>
    tpu.vector_store %arg6[%c0_26, %c0_27, %c0_28], %30 {strides = array<i32>} : memref<1x32x256xf32, #tpu.memory_space<vmem>>, vector<1x32x256xf32>,
    %cst_29 = arith.constant dense<0.000000e+00> : vector<32xf32>
    %31 = vector.multi_reduction <add>, %26, %cst_29 [0] : vector<256x32xf32> to vector<32xf32>
    %32 = vector.shape_cast %31 : vector<32xf32> to vector<1x32xf32>
    %c0_30 = arith.constant 0 : index
    %c0_31 = arith.constant 0 : index
    %33 = vector.load %arg4[%c0_30, %c0_31] : memref<32x10xf32, #tpu.memory_space<vmem>>, vector<32x10xf32>
    %cst_32 = arith.constant dense<0.000000e+00> : vector<1x10xf32>
    %34 = tpu.matmul %32, %33, %cst_32 {dimension_numbers = #tpu.dot_dimension_numbers<[1], [0], [0], [1], [0, 0, 1, 1], [], []>} : vector<1x32xf32>, vector<32x10xf32>, vector<1x10xf32> -> vector<1x10xf32>
    %c0_33 = arith.constant 0 : index
    %c0_34 = arith.constant 0 : index
    %35 = vector.load %arg5[%c0_33, %c0_34] : memref<1x10xf32, #tpu.memory_space<vmem>>, vector<1x10xf32>
    %36 = arith.addf %34, %35 : vector<1x10xf32>
    %37 = vector.shape_cast %36 : vector<1x10xf32> to vector<1x1x10xf32>
    %c0_35 = arith.constant 0 : index
    %c0_36 = arith.constant 0 : index
    %c0_37 = arith.constant 0 : index
    %38 = vector.load %arg7[%c0_35, %c0_36, %c0_37] : memref<1x1x10xf32, #tpu.memory_space<vmem>>, vector<1x1x10xf32>
    tpu.vector_store %arg7[%c0_35, %c0_36, %c0_37], %37 {strides = array<i32>} : memref<1x1x10xf32, #tpu.memory_space<vmem>>, vector<1x1x10xf32>,
    return
  }
  func.func @transform_0(%arg0: i32) -> (i32, i32, i32, i32) {
    %c0_i32 = arith.constant 0 : i32
    %c0_i32_0 = arith.constant 0 : i32
    %c0_i32_1 = arith.constant 0 : i32
    %c0_i32_2 = arith.constant 0 : i32
    return %arg0, %c0_i32, %c0_i32_0, %c0_i32_1 : i32, i32, i32, i32
  }
  func.func @transform_1(%arg0: i32) -> (i32, i32) {
    %c0_i32 = arith.constant 0 : i32
    %c0_i32_0 = arith.constant 0 : i32
    %c0_i32_1 = arith.constant 0 : i32
    return %c0_i32, %c0_i32_0 : i32, i32
  }
  func.func @transform_2(%arg0: i32) -> (i32, i32) {
    %c0_i32 = arith.constant 0 : i32
    %c0_i32_0 = arith.constant 0 : i32
    %c0_i32_1 = arith.constant 0 : i32
    return %c0_i32, %c0_i32_0 : i32, i32
  }
  func.func @transform_3(%arg0: i32) -> (i32, i32) {
    %c0_i32 = arith.constant 0 : i32
    %c0_i32_0 = arith.constant 0 : i32
    %c0_i32_1 = arith.constant 0 : i32
    return %c0_i32, %c0_i32_0 : i32, i32
  }
  func.func @transform_4(%arg0: i32) -> (i32, i32) {
    %c0_i32 = arith.constant 0 : i32
    %c0_i32_0 = arith.constant 0 : i32
    %c0_i32_1 = arith.constant 0 : i32
    return %c0_i32, %c0_i32_0 : i32, i32
  }
  func.func @transform_5(%arg0: i32) -> (i32, i32, i32) {
    %c0_i32 = arith.constant 0 : i32
    %c0_i32_0 = arith.constant 0 : i32
    %c0_i32_1 = arith.constant 0 : i32
    return %arg0, %c0_i32, %c0_i32_0 : i32, i32, i32
  }
  func.func @transform_6(%arg0: i32) -> (i32, i32, i32) {
    %c0_i32 = arith.constant 0 : i32
    %c0_i32_0 = arith.constant 0 : i32
    %c0_i32_1 = arith.constant 0 : i32
    return %arg0, %c0_i32, %c0_i32_0 : i32, i32, i32
  }
}

</mosaic_0001>

<bundles_post_ra>
// kernel: fused_forward.1
= control target key start
LH: loop header
LB: loop body
LE: loop exit
PB: predicated region body
PF: predicated region fallthrough
CT: control target
= control target key end

     0   :  { %12 = vsyncpa [#allocation5], 0  ;;  %s3736_s0 = inlined_call_operand.vmem [shape: bf16[2,16,16,4], index: 0, kind: input, shape index: {}]   ;;  %s3737_s1 = inlined_call_operand.vmem [shape: bf16[36,32], index: 1, kind: input, shape index: {}]   ;;  %s3738_s2 = inlined_call_operand.vmem [shape: f32[1,32], index: 2, kind: input, shape index: {}]   ;;  %s3739_s3 = inlined_call_operand.vmem [shape: f32[32,10], index: 3, kind: input, shape index: {}]   ;;  %s3740_s4 = inlined_call_operand.vmem [shape: f32[1,10], index: 4, kind: input, shape index: {}]   ;;  %s3741_s5 = inlined_call_operand.vmem [shape: f32[2,32,256], index: 5, kind: output, shape index: {0}]   ;;  %s3742_s6 = inlined_call_operand.hbm [shape: f32[2,1,10], index: 6, kind: output, shape index: {1}]  }
   0x1   :  { %14 = vsyncpa [#allocation5 + $0x1], 0  ;;  %s2788_s21 = smov 0   ;;  %s2790_s22 = smov 0  }
   0x2   :  { %s2792_s23 = smov 0   ;;  %s2794_s24 = smov 0  }
   0x3 LB: > { %s2809_s25 = sadd.s32 4294967295, %s2738_s24   ;;  %s2425_s26 = sadd.s32 4294967294, %s2738_s24   ;;  %s2738_s24 = sphi %s2794_s24, %s3754_s24   ;;  %s2734_s23 = sphi %s2792_s23, %s3753_s23   ;;  %s2730_s22 = sphi %s2790_s22, %s3752_s22   ;;  %s2726_s21 = sphi %s2788_s21, %s3751_s21  }
   0x4   : > { %s2813_s27 = sadd.s32 1, %s2738_s24   ;;  %s163_s28 = sadd.s32 1, %s2734_s23 }
   0x5   : > { %s160_s29 = ssub.s32 %s2738_s24, %s2813_s27  ;;  %p173_p0 = scmp.ne.s32.totalorder %s2734_s23, %s2730_s22 }
   0x6   : > { %p161_p1 = scmp.eq.s32.totalorder %s160_s29, 0  ;;  %p174_p2 = scmp.eq.s32.totalorder %s2809_s25, 1 }
   0x7   : > { %p179_p3 = scmp.ne.s32.totalorder %s2730_s22, %s2726_s21  ;;  %p180_p4 = scmp.eq.s32.totalorder %s2425_s26, 1 }
   0x8   : > { %s2824_s30 = scalar_select %p161_p1, %s2734_s23, %s163_s28  }
   0x9   : > { %p2826_p5 = por %p174_p2, %p173_p0  ;;  %p2830_p6 = por %p180_p4, %p179_p3 }
   0xa   : > { %p2428_p7 = scmp.ge.s32.totalorder %s2738_s24, 1  ;;  %p218_p8 = scmp.lt.s32.totalorder %s2738_s24, 3 }
   0xc   : > { %p219_p9 = pnand %p2428_p7, %p218_p8 }
   0xd   : > { %vm263_vm0 = vcmask (!%p219_p9), 27648   ;;  %vm266_vm1 = vcmask (!%p219_p9), 24576   ;;  %v2740_v0 = vmov (!%p219_p9), 0   ;;  %p252_p10 = scmp.lt.s32.totalorder (!%p219_p9), %s2809_s25, 1  ;;  %vm974_vm2 = vsmask.f32 (!%p219_p9), 7424 }
   0xe   : > { %222 = sbr.rel (%p219_p9) target bundleno = 893 (0x37d), region = 40  ;;  %264 = vst.msk [vmem:[#allocation2] sm:$0xf] (!%p219_p9), %vm263_vm0, %v2740_v0  ;;  %265 = vst.msk [vmem:[#allocation2 + $0x4] sm:$0xf] (!%p219_p9), %vm263_vm0, %v2740_v0  ;;  %vm1199_vm6 = vcmask (!%p219_p9), 1046528  }
   0xf   : > { %267 = vst.msk [vmem:[#allocation2 + $0x8] sm:$0x1] (!%p219_p9), %vm266_vm1, %v2740_v0  ;;  %270 = vst.msk [vmem:[#allocation2 + $0x14] sm:$0x1] (!%p219_p9), %vm266_vm1, %v2740_v0  ;;  %vm351_vm3 = vsmask.f32 (!%p219_p9), 256 }
  0x10   : > { %268 = vst.msk [vmem:[#allocation2 + $0xc] sm:$0xf] (!%p219_p9), %vm263_vm0, %v2740_v0  ;;  %269 = vst.msk [vmem:[#allocation2 + $0x10] sm:$0xf] (!%p219_p9), %vm263_vm0, %v2740_v0  ;;  %vm352_vm4 = vsmask.f32 (!%p219_p9), 4368 }
  0x11   : > { %271 = vst.msk [vmem:[#allocation2 + $0x18] sm:$0xf] (!%p219_p9), %vm263_vm0, %v2740_v0  ;;  %272 = vst.msk [vmem:[#allocation2 + $0x1c] sm:$0xf] (!%p219_p9), %vm263_vm0, %v2740_v0  ;;  %vm676_vm5 = vsmask.f32 (!%p219_p9), 7938 }
  0x12   : > { %273 = vst.msk [vmem:[#allocation2 + $0x20] sm:$0x1] (!%p219_p9), %vm266_vm1, %v2740_v0  ;;  %276 = vst.msk [vmem:[#allocation2 + $0x2c] sm:$0x1] (!%p219_p9), %vm266_vm1, %v2740_v0  ;;  %s2741_s14 = smov (!%p219_p9), 8   ;;  %s2742_s15 = smov (!%p219_p9), 4  }
  0x13   : > { %274 = vst.msk [vmem:[#allocation2 + $0x24] sm:$0xf] (!%p219_p9), %vm263_vm0, %v2740_v0  ;;  %275 = vst.msk [vmem:[#allocation2 + $0x28] sm:$0xf] (!%p219_p9), %vm263_vm0, %v2740_v0  ;;  %s2743_s16 = smov (!%p219_p9), 12   ;;  %s2744_s17 = smov (!%p219_p9), 24  }
  0x14   : > { %277 = vst.msk [vmem:[#allocation2 + $0x30] sm:$0xf] (!%p219_p9), %vm263_vm0, %v2740_v0  ;;  %278 = vst.msk [vmem:[#allocation2 + $0x34] sm:$0xf] (!%p219_p9), %vm263_vm0, %v2740_v0  ;;  %s2745_s20 = smov (!%p219_p9), 20   ;;  %s2746_s29 = smov (!%p219_p9), 32  }
  0x15   : > { %279 = vst.msk [vmem:[#allocation2 + $0x38] sm:$0x1] %vm266_vm1, %v2740_v0  ;;  %282 = vst.msk [vmem:[#allocation2 + $0x44] sm:$0x1] %vm266_vm1, %v2740_v0  ;;  %s2892_s9 = scalar_select %p252_p10, %s2809_s25, 1  ;;  %v2633_v4 = vld [vmem:[#allocation2] sm:$0xff]  }
  0x16   : > { %280 = vst.msk [vmem:[#allocation2 + $0x3c] sm:$0xf] %vm263_vm0, %v2740_v0  ;;  %281 = vst.msk [vmem:[#allocation2 + $0x40] sm:$0xf] %vm263_vm0, %v2740_v0  ;;  %v1200_v11 = vrot.slane %v2633_v4, 1  ;;  %v976_v13 = vshrl.u32 %v2633_v4, 16 }
  0x17   : > { %283 = vst.msk [vmem:[#allocation2 + $0x48] sm:$0xf] %vm263_vm0, %v2740_v0  ;;  %284 = vst.msk [vmem:[#allocation2 + $0x4c] sm:$0xf] %vm263_vm0, %v2740_v0  ;;  %s2493_s10 = sshll.u32 %s2892_s9, 7  ;;  %v978_v14 = vshll.u32 %v2633_v4, 16 }
  0x18   : > { %285 = vst.msk [vmem:[#allocation2 + $0x50] sm:$0x1] %vm266_vm1, %v2740_v0  ;;  %288 = vst.msk [vmem:[#allocation2 + $0x5c] sm:$0x1] %vm266_vm1, %v2740_v0  ;;  %s2898_s13 = scalar_lea.vmem %s3736_s0, %s2493_s10  ;;  %v687_v19 = vld [vmem:[#allocation2 + $0x18] sm:$0xf] }
  0x19   : > { %286 = vst.msk [vmem:[#allocation2 + $0x54] sm:$0xf] %vm263_vm0, %v2740_v0  ;;  %287 = vst.msk [vmem:[#allocation2 + $0x58] sm:$0xf] %vm263_vm0, %v2740_v0  ;;  %v321_v1 = vld [vmem:[%s2898_s13 + $0x8] sm:$0xf] }
  0x1a   : > { %289 = vst.msk [vmem:[#allocation2 + $0x60] sm:$0xf] %vm263_vm0, %v2740_v0  ;;  %290 = vst.msk [vmem:[#allocation2 + $0x64] sm:$0xf] %vm263_vm0, %v2740_v0  ;;  %v322_v2 = vld [vmem:[%s2898_s13 + $0xc] sm:$0xf] }
  0x1b   : > { %291 = vst.msk [vmem:[#allocation2 + $0x68] sm:$0x1] %vm266_vm1, %v2740_v0  ;;  %294 = vst.msk [vmem:[#allocation2 + $0x74] sm:$0x1] %vm266_vm1, %v2740_v0  ;;  %v319_v3 = vld [vmem:[%s2898_s13] sm:$0xf] }
  0x1c   : > { %292 = vst.msk [vmem:[#allocation2 + $0x6c] sm:$0xf] %vm263_vm0, %v2740_v0  ;;  %293 = vst.msk [vmem:[#allocation2 + $0x70] sm:$0xf] %vm263_vm0, %v2740_v0  ;;  %v372_v6 = vshrl.u32 %v321_v1, 16  ;;  %v375_v7 = vshll.u32 %v321_v1, 16 }
  0x1d   : > { %295 = vst.msk [vmem:[#allocation2 + $0x78] sm:$0xf] %vm263_vm0, %v2740_v0  ;;  %296 = vst.msk [vmem:[#allocation2 + $0x7c] sm:$0xf] %vm263_vm0, %v2740_v0  ;;  %v380_v8 = vshrl.u32 %v322_v2, 16  ;;  %v383_v9 = vshll.u32 %v322_v2, 16 }
  0x1e   : > { %297 = vst.msk [vmem:[#allocation2 + $0x80] sm:$0x1] %vm266_vm1, %v2740_v0  ;;  %300 = vst.msk [vmem:[#allocation2 + $0x8c] sm:$0x1] %vm266_vm1, %v2740_v0  ;;  %v320_v10 = vld [vmem:[%s2898_s13 + $0x4] sm:$0xf] }
  0x1f   : > { %298 = vst.msk [vmem:[#allocation2 + $0x84] sm:$0xf] %vm263_vm0, %v2740_v0  ;;  %299 = vst.msk [vmem:[#allocation2 + $0x88] sm:$0xf] %vm263_vm0, %v2740_v0  ;;  %v374_v17 = vrot.slane %v372_v6, 7  ;;  %v382_v18 = vrot.slane %v380_v8, 7 }
  0x20   : > { %301 = vst.msk [vmem:[#allocation2 + $0x90] sm:$0xf] %vm263_vm0, %v2740_v0  ;;  %302 = vst.msk [vmem:[#allocation2 + $0x94] sm:$0xf] %vm263_vm0, %v2740_v0  ;;  %v355_v20 = vshrl.u32 %v319_v3, 16  ;;  %v980_v22 = vrot.slane %v978_v14, 1 }
  0x21   : > { %303 = vst.msk [vmem:[#allocation2 + $0x98] sm:$0x1] %vm266_vm1, %v2740_v0  ;;  %306 = vst.msk [vmem:[#allocation2 + $0xa4] sm:$0x1] %vm266_vm1, %v2740_v0  ;;  %v358_v24 = vshll.u32 %v319_v3, 16  ;;  %v363_v25 = vshrl.u32 %v320_v10, 16  ;;  %v377_v28 = vor.u32 %v375_v7, %v374_v17  ;;  %v385_v30 = vor.u32 %v383_v9, %v382_v18 }
  0x22   : > { %304 = vst.msk [vmem:[#allocation2 + $0x9c] sm:$0xf] %vm263_vm0, %v2740_v0  ;;  %305 = vst.msk [vmem:[#allocation2 + $0xa0] sm:$0xf] %vm263_vm0, %v2740_v0  ;;  %v323_v26 = vld [vmem:[%s2898_s13 + $0x10] sm:$0xf]  ;;  %v981_v31 = vor.u32 %v980_v22, %v976_v13 }
  0x23   : > { %307 = vst.msk [vmem:[#allocation2 + $0xa8] sm:$0xf] %vm263_vm0, %v2740_v0  ;;  %308 = vst.msk [vmem:[#allocation2 + $0xac] sm:$0xf] %vm263_vm0, %v2740_v0  ;;  %v378_v29 = vrot.slane %v374_v17, 4  ;;  %v357_v32 = vrot.slane %v355_v20, 7 }
  0x24   : > { %309 = vst.msk [vmem:[#allocation2 + $0xb0] sm:$0x1] %vm266_vm1, %v2740_v0  ;;  %312 = vst.msk [vmem:[#allocation2 + $0xbc] sm:$0x1] %vm266_vm1, %v2740_v0  ;;  %v365_v33 = vrot.slane %v363_v25, 7  ;;  %v366_v34 = vshll.u32 %v320_v10, 16 }
  0x25   : > { %310 = vst.msk [vmem:[#allocation2 + $0xb4] sm:$0xf] %vm263_vm0, %v2740_v0  ;;  %311 = vst.msk [vmem:[#allocation2 + $0xb8] sm:$0xf] %vm263_vm0, %v2740_v0  ;;  %v324_v35 = vld [vmem:[%s2898_s13 + $0x14] sm:$0xf]  ;;  %v360_v43 = vor.u32 %v358_v24, %v357_v32 }
  0x26   : > { %313 = vst.msk [vmem:[#allocation2 + $0xc0] sm:$0xf] %vm263_vm0, %v2740_v0  ;;  %314 = vst.msk [vmem:[#allocation2 + $0xc4] sm:$0xf] %vm263_vm0, %v2740_v0  ;;  %v678_v38 = vld [vmem:[#allocation2 + $0xc] sm:$0xf]  ;;  %v368_v45 = vor.u32 %v366_v34, %v365_v33 }
  0x27   : > { %315 = vst.msk [vmem:[#allocation2 + $0xc8] sm:$0x1] %vm266_vm1, %v2740_v0  ;;  %318 = vst.msk [vmem:[#allocation2 + $0xd4] sm:$0x1] %vm266_vm1, %v2740_v0  ;;  %v389_v39 = vshrl.u32 %v323_v26, 16  ;;  %v392_v40 = vshll.u32 %v323_v26, 16 }
  0x28   : > { %316 = vst.msk [vmem:[#allocation2 + $0xcc] sm:$0xf] %vm263_vm0, %v2740_v0  ;;  %317 = vst.msk [vmem:[#allocation2 + $0xd0] sm:$0xf] %vm263_vm0, %v2740_v0  ;;  %v325_v41 = vld [vmem:[%s2898_s13 + $0x18] sm:$0xf] }
  0x29   : > { %v2634_v5 = vld [vmem:[#allocation2 + $0x8] ss:$0 sps:$4 sm:$0x11]   ;;  %vm2906_vm7 = vmor %vm351_vm3, %vm352_vm4  ;;  %v361_v44 = vrot.slane %v357_v32, 4  ;;  %v684_v47 = vld [vmem:[#allocation2 + $0x14] sm:$0x1] }
  0x2a   : > { %v1201_v12 = vrot.slane %v2634_v5, 1  ;;  %v983_v15 = vshll.u32 %v2634_v5, 16  ;;  %vm2913_vm8 = vmand %vm263_vm0, %vm676_vm5  ;;  %v386_v36 = vsel %vm2906_vm7, %v378_v29, %v385_v30  ;;  %v691_v48 = vld [vmem:[#allocation2 + $0x20] sm:$0x1]  ;;  %v391_v49 = vrot.slane %v389_v39, 7  ;;  %s2747_s10 = smov 16  }
  0x2b   : > { %v688_v37 = vsel %vm2913_vm8, %v377_v28, %v687_v19  ;;  %690 = vst.msk [vmem:[#allocation2 + $0x1c] sm:$0xf] %vm263_vm0, %v386_v36  ;;  %vm2929_vm9 = vmand %vm266_vm1, %vm351_vm3  ;;  %v397_v50 = vshrl.u32 %v324_v35, 16  ;;  %v400_v51 = vshll.u32 %v324_v35, 16  ;;  %v370_v52 = vrot.slane %v365_v33, 4  ;;  %s2748_s11 = smov 28  }
  0x2c   : > { %v1202_v21 = vsel %vm1199_vm6, %v1200_v11, %v1201_v12  ;;  %v985_v27 = vrot.slane %v983_v15, 1  ;;  %689 = vst [vmem:[#allocation2 + $0x18] sm:$0xf] %v688_v37  ;;  %v326_v53 = vld [vmem:[%s2898_s13 + $0x1c] sm:$0xf]  ;;  %v369_v54 = vsel %vm2906_vm7, %v361_v44, %v368_v45  ;;  %v679_v55 = vsel %vm2913_vm8, %v360_v43, %v678_v38 }
  0x2d   : > { %1248 = vrot.lane.b32.xlu1 %v1202_v21, %s2741_s14  ;;  %v694_v56 = vld [vmem:[#allocation2 + $0x24] sm:$0xf]  ;;  %v387_v57 = vrot.slane %v382_v18, 4  ;;  %v406_v58 = vshrl.u32 %v325_v41, 16  ;;  %680 = vst [vmem:[#allocation2 + $0xc] sm:$0xf] %v679_v55  ;;  %v394_v59 = vor.u32 %v392_v40, %v391_v49  ;;  %v685_v62 = vsel %vm2929_vm9, %v370_v52, %v684_v47 }
  0x2e   : > { %v986_v42 = vsel %vm974_vm2, %v981_v31, %v985_v27  ;;  %681 = vst.msk [vmem:[#allocation2 + $0x10] sm:$0xf] %vm263_vm0, %v369_v54  ;;  %v395_v60 = vrot.slane %v391_v49, 4  ;;  %v399_v61 = vrot.slane %v397_v50, 7  ;;  %v327_v63 = vld [vmem:[%s2898_s13 + $0x20] sm:$0xf] }
  0x2f   : > { %1167 = vrot.lane.b32.xlu0 %v986_v42, %s2742_s15  ;;  %686 = vst [vmem:[#allocation2 + $0x14] sm:$0x1] %v685_v62  ;;  %v692_v0 = vsel %vm2929_vm9, %v387_v57, %v691_v48  ;;  %v698_v1 = vld [vmem:[#allocation2 + $0x2c] sm:$0x1]  ;;  %v408_v2 = vrot.slane %v406_v58, 7  ;;  %v409_v3 = vshll.u32 %v325_v41, 16  ;;  %v695_v6 = vsel %vm2913_vm8, %v394_v59, %v694_v56 }
  0x30   : > { %v414_v4 = vshrl.u32 %v326_v53, 16  ;;  %v402_v5 = vor.u32 %v400_v51, %v399_v61  ;;  %693 = vst [vmem:[#allocation2 + $0x20] sm:$0x1] %v692_v0  ;;  %v404_v7 = vrot.slane %v399_v61, 4  ;;  %v417_v8 = vshll.u32 %v326_v53, 16  ;;  %v2653_v54 = vld [vmem:[%s3737_s1] sm:$0xff]  }
  0x31   : > { %v701_v9 = vld [vmem:[#allocation2 + $0x30] sm:$0xf]  ;;  %v705_v10 = vld [vmem:[#allocation2 + $0x38] sm:$0x1]  ;;  %696 = vst [vmem:[#allocation2 + $0x24] sm:$0xf] %v695_v6  ;;  %v411_v11 = vor.u32 %v409_v3, %v408_v2  ;;  %2519 = vmatprep.subr.bf16.mxu0 %v2653_v54  ;;  %2574 = vmatprep.subr.bf16.mxu1 %v2653_v54 }
  0x32   : > { %v412_v12 = vrot.slane %v408_v2, 4  ;;  %v416_v13 = vrot.slane %v414_v4, 7  ;;  %v328_v14 = vld [vmem:[%s2898_s13 + $0x24] sm:$0xf]  ;;  %v423_v15 = vshrl.u32 %v327_v63, 16  ;;  %v403_v18 = vsel %vm2906_vm7, %v395_v60, %v402_v5  ;;  %2520 = vmatpush3.bf16.msra.mxu0 %v2653_v54  ;;  %2577 = vmatpush3.bf16.msra.mxu1 %v2653_v54 }
  0x33   : > { %v2948_v17 = vld [vmem:[#allocation2 + $0x18] sm:$0xff]   ;;  %v699_v19 = vsel %vm2929_vm9, %v404_v7, %v698_v1  ;;  %v426_v20 = vshll.u32 %v327_v63, 16  ;;  %697 = vst.msk [vmem:[#allocation2 + $0x28] sm:$0xf] %vm263_vm0, %v403_v18  ;;  %v702_v22 = vsel %vm2913_vm8, %v411_v11, %v701_v9  ;;  %v431_v32 = vshrl.u32 %v328_v14, 16  ;;  %v2655_v1 = vld [vmem:[%s3737_s1 + $0x8] sm:$0xff]  }
  0x34   : > { %700 = vst [vmem:[#allocation2 + $0x2c] sm:$0x1] %v699_v19  ;;  %v419_v21 = vor.u32 %v417_v8, %v416_v13  ;;  %v421_v24 = vrot.slane %v416_v13, 4  ;;  %v2957_v25 = vrot.slane %v423_v15, 7  ;;  %1287 = vrot.lane.b32.xlu1 %v2948_v17, %s2743_s16  ;;  %v1002_v26 = vshll.u32 %v2948_v17, 16  ;;  %2521 = vmatprep.subr.bf16.mxu0 %v2655_v1 }
  0x35   : > { %703 = vst [vmem:[#allocation2 + $0x30] sm:$0xf] %v702_v22  ;;  %v708_v27 = vld [vmem:[#allocation2 + $0x3c] sm:$0xf]  ;;  %v2962_v28 = vld [vmem:[#allocation2 + $0xc] sm:$0xff]   ;;  %v1000_v39 = vshrl.u32 %v2948_v17, 16  ;;  %2575 = vmatprep.subr.bf16.mxu1 %v2655_v1 }
  0x36   : > { %v420_v29 = vsel %vm2906_vm7, %v412_v12, %v419_v21  ;;  %v706_v30 = vsel %vm2929_vm9, %v421_v24, %v705_v10  ;;  %v428_v31 = vor.u32 %v426_v20, %v2957_v25  ;;  %v2638_v33 = vld [vmem:[#allocation2 + $0x14] ss:$0 sps:$4 sm:$0x11]   ;;  %1285 = vrot.lane.b32.xlu0 %v2962_v28, %s2743_s16  ;;  %v1203_v36 = vrot.slane %v2962_v28, 1  ;;  %v329_v62 = vld [vmem:[%s2898_s13 + $0x28] sm:$0xf]  ;;  %2522 = vmatpush3.bf16.msra.mxu0 %v2655_v1 }
  0x37   : > { %704 = vst.msk [vmem:[#allocation2 + $0x34] sm:$0xf] %vm263_vm0, %v420_v29  ;;  %707 = vst [vmem:[#allocation2 + $0x38] sm:$0x1] %v706_v30  ;;  %v1204_v37 = vrot.slane %v2638_v33, 1  ;;  %v990_v38 = vshll.u32 %v2962_v28, 16  ;;  %2578 = vmatpush3.bf16.msra.mxu1 %v2655_v1 }
  0x38   : > { %v2639_v34 = vld [vmem:[#allocation2 + $0x20] ss:$0 sps:$4 sm:$0x11]   ;;  %v709_v35 = vsel %vm2913_vm8, %v428_v31, %v708_v27  ;;  %v1004_v40 = vrot.slane %v1002_v26, 1  ;;  %v988_v41 = vshrl.u32 %v2962_v28, 16  ;;  %v433_v42 = vrot.slane %v431_v32, 7 }
  0x39   : > { %710 = vst [vmem:[#allocation2 + $0x3c] sm:$0xf] %v709_v35  ;;  %v1007_v44 = vshll.u32 %v2639_v34, 16  ;;  %v992_v45 = vrot.slane %v990_v38, 1  ;;  %v995_v47 = vshll.u32 %v2638_v33, 16  ;;  %v434_v49 = vshll.u32 %v328_v14, 16 }
  0x3a   : > { %v2978_v43 = vld [vmem:[#allocation2 + $0x24] sm:$0xff]   ;;  %1404 = vrot.lane.b32.xlu0 %v2948_v17, %s2744_s17  ;;  %v1205_v50 = vsel %vm1199_vm6, %v1203_v36, %v1204_v37  ;;  %v1206_v51 = vrot.slane %v2948_v17, 1  ;;  %v1207_v52 = vrot.slane %v2639_v34, 1  ;;  %v429_v57 = vrot.slane %v2957_v25, 4  ;;  %v330_v5 = vld [vmem:[%s2898_s13 + $0x2c] sm:$0xf] }
  0x3b   : > { %v2982_v48 = vld [vmem:[#allocation2 + $0x2c] ss:$0 sps:$4 sm:$0x11]   ;;  %1406 = vrot.lane.b32.xlu1 %v2978_v43, %s2744_s17  ;;  %v1014_v53 = vshll.u32 %v2978_v43, 16  ;;  %v1012_v55 = vshrl.u32 %v2978_v43, 16  ;;  %v436_v58 = vor.u32 %v434_v49, %v433_v42  ;;  %v1005_v59 = vor.u32 %v1004_v40, %v1000_v39 }
  0x3c   : > { %v1019_v56 = vshll.u32 %v2982_v48, 16  ;;  %v1009_v60 = vrot.slane %v1007_v44, 1  ;;  %v993_v63 = vor.u32 %v992_v45, %v988_v41  ;;  %v997_v0 = vrot.slane %v995_v47, 1  ;;  %v712_v4 = vld [vmem:[#allocation2 + $0x44] sm:$0x1] }
  0x3d   : > { %v1016_v61 = vrot.slane %v1014_v53, 1  ;;  %v3002_v2 = vsel %vm1199_vm6, %v1206_v51, %v1207_v52  ;;  %v437_v7 = vsel %vm2906_vm7, %v429_v57, %v436_v58  ;;  %v438_v8 = vrot.slane %v433_v42, 4  ;;  %v331_v10 = vld [vmem:[%s2898_s13 + $0x30] sm:$0xf]  ;;  %v332_v11 = vld [vmem:[%s2898_s13 + $0x34] sm:$0xf] }
  0x3e   : > { %1367 = vrot.lane.b32.xlu0 %v1205_v50, %s2745_s20  ;;  %v1021_v3 = vrot.slane %v1019_v56, 1  ;;  %v440_v9 = vshrl.u32 %v329_v62, 16  ;;  %v3010_v12 = vsel %vm974_vm2, %v1005_v59, %v1009_v60  ;;  %711 = vst.msk [vmem:[#allocation2 + $0x40] sm:$0xf] %vm263_vm0, %v437_v7  ;;  %v443_v13 = vshll.u32 %v329_v62, 16 }
  0x3f   : > { %1250 = vrot.lane.b32.xlu1 %v1205_v50, %s2741_s14  ;;  %v1017_v6 = vor.u32 %v1016_v61, %v1012_v55  ;;  %v998_v14 = vsel %vm974_vm2, %v993_v63, %v997_v0  ;;  %v713_v15 = vsel %vm2929_vm9, %v438_v8, %v712_v4  ;;  %v448_v18 = vshrl.u32 %v330_v5, 16  ;;  %v333_v19 = vld [vmem:[%s2898_s13 + $0x38] sm:$0xf]  ;;  %v715_v21 = vld [vmem:[#allocation2 + $0x48] sm:$0xf] }
  0x40   : > { %v442_v17 = vrot.slane %v440_v9, 7  ;;  %714 = vst [vmem:[#allocation2 + $0x44] sm:$0x1] %v713_v15  ;;  %v451_v20 = vshll.u32 %v330_v5, 16  ;;  %v457_v22 = vshrl.u32 %v331_v10, 16  ;;  %v460_v24 = vshll.u32 %v331_v10, 16 }
  0x41   : > { %v465_v25 = vshrl.u32 %v332_v11, 16  ;;  %v3022_v26 = vsel %vm974_vm2, %v1017_v6, %v1021_v3  ;;  %v450_v30 = vrot.slane %v448_v18, 7  ;;  %v719_v31 = vld [vmem:[#allocation2 + $0x50] sm:$0x1]  ;;  %v468_v34 = vshll.u32 %v332_v11, 16 }
  0x42   : > { %1486 = vrot.lane.b32.xlu0 %v3002_v2, %s2746_s29  ;;  %v445_v27 = vor.u32 %v443_v13, %v442_v17  ;;  %v446_v29 = vrot.slane %v442_v17, 4  ;;  %v459_v32 = vrot.slane %v457_v22, 7  ;;  %v334_v35 = vld [vmem:[%s2898_s13 + $0x3c] sm:$0xf]  ;;  %v474_v36 = vshrl.u32 %v333_v19, 16  ;;  %v3049_v3 = vld [vmem:[#allocation2 + $0x30] sm:$0xff]  }
  0x43   : > { %1369 = vrot.lane.b32.xlu1 %v3002_v2, %s2745_s20  ;;  %v467_v33 = vrot.slane %v465_v25, 7  ;;  %v453_v37 = vor.u32 %v451_v20, %v450_v30  ;;  %v455_v39 = vrot.slane %v450_v30, 4  ;;  %v722_v40 = vld [vmem:[#allocation2 + $0x54] sm:$0xf]  ;;  %v726_v41 = vld [vmem:[#allocation2 + $0x5c] sm:$0x1] }
  0x44   : > { %v716_v38 = vsel %vm2913_vm8, %v445_v27, %v715_v21  ;;  %v477_v42 = vshll.u32 %v333_v19, 16  ;;  %v462_v44 = vor.u32 %v460_v24, %v459_v32  ;;  %v463_v45 = vrot.slane %v459_v32, 4  ;;  %v729_v58 = vld [vmem:[#allocation2 + $0x60] sm:$0xf]  ;;  %v336_v1 = vld [vmem:[%s2898_s13 + $0x44] sm:$0xf] }
  0x45   : > { %717 = vst [vmem:[#allocation2 + $0x48] sm:$0xf] %v716_v38  ;;  %v470_v47 = vor.u32 %v468_v34, %v467_v33  ;;  %v472_v49 = vrot.slane %v467_v33, 4  ;;  %v454_v50 = vsel %vm2906_vm7, %v446_v29, %v453_v37  ;;  %v720_v51 = vsel %vm2929_vm9, %v455_v39, %v719_v31  ;;  %v335_v60 = vld [vmem:[%s2898_s13 + $0x40] sm:$0xf] }
  0x46   : > { %1169 = vrot.lane.b32.xlu0 %v998_v14, %s2742_s15  ;;  %v476_v52 = vrot.slane %v474_v36, 7  ;;  %v482_v53 = vshrl.u32 %v334_v35, 16  ;;  %718 = vst.msk [vmem:[#allocation2 + $0x4c] sm:$0xf] %vm263_vm0, %v454_v50  ;;  %721 = vst [vmem:[#allocation2 + $0x50] sm:$0x1] %v720_v51  ;;  %v723_v55 = vsel %vm2913_vm8, %v462_v44, %v722_v40 }
  0x47   : > { %1334 = vrot.lane.b32.xlu1 %v3010_v12, %s2747_s10  ;;  %v471_v54 = vsel %vm2906_vm7, %v463_v45, %v470_v47  ;;  %v727_v56 = vsel %vm2929_vm9, %v472_v49, %v726_v41  ;;  %v485_v57 = vshll.u32 %v334_v35, 16  ;;  %724 = vst [vmem:[#allocation2 + $0x54] sm:$0xf] %v723_v55  ;;  %v1209_v61 = vrot.slane %v2978_v43, 1  ;;  %v733_v5 = vld [vmem:[#allocation2 + $0x68] sm:$0x1] }
  0x48   : > { %725 = vst.msk [vmem:[#allocation2 + $0x58] sm:$0xf] %vm263_vm0, %v471_v54  ;;  %728 = vst [vmem:[#allocation2 + $0x5c] sm:$0x1] %v727_v56  ;;  %v479_v59 = vor.u32 %v477_v42, %v476_v52  ;;  %v1210_v62 = vrot.slane %v2982_v48, 1  ;;  %v480_v63 = vrot.slane %v476_v52, 4 }
  0x49   : > { %v484_v0 = vrot.slane %v482_v53, 7  ;;  %v491_v8 = vshrl.u32 %v335_v60, 16  ;;  %v494_v9 = vshll.u32 %v335_v60, 16  ;;  %v499_v10 = vshrl.u32 %v336_v1, 16  ;;  %v736_v19 = vld [vmem:[#allocation2 + $0x6c] sm:$0xf] }
  0x4a   : > { %1332 = vrot.lane.b32.xlu0 %v998_v14, %s2747_s10  ;;  %v730_v4 = vsel %vm2913_vm8, %v479_v59, %v729_v58  ;;  %v3058_v48 = vsel %vm1199_vm6, %v1209_v61, %v1210_v62  ;;  %v2642_v11 = vld [vmem:[#allocation2 + $0x38] ss:$0 sps:$4 sm:$0x11]   ;;  %v1026_v17 = vshll.u32 %v3049_v3, 16  ;;  %v1024_v20 = vshrl.u32 %v3049_v3, 16  ;;  %v3078_v33 = vld [vmem:[#allocation2 + $0x3c] sm:$0xff]  }
  0x4b   : > { %1453 = vrot.lane.b32.xlu1 %v3022_v26, %s2748_s11  ;;  %v487_v6 = vor.u32 %v485_v57, %v484_v0  ;;  %731 = vst [vmem:[#allocation2 + $0x60] sm:$0xf] %v730_v4  ;;  %v489_v7 = vrot.slane %v484_v0, 4  ;;  %v493_v15 = vrot.slane %v491_v8, 7  ;;  %v1031_v21 = vshll.u32 %v2642_v11, 16 }
  0x4c   : > { %v1028_v22 = vrot.slane %v1026_v17, 1  ;;  %v502_v25 = vshll.u32 %v336_v1, 16  ;;  %v337_v30 = vld [vmem:[%s2898_s13 + $0x48] sm:$0xf]  ;;  %v740_v35 = vld [vmem:[#allocation2 + $0x74] sm:$0x1] }
  0x4d   : > { %v488_v13 = vsel %vm2906_vm7, %v480_v63, %v487_v6  ;;  %v734_v14 = vsel %vm2929_vm9, %v489_v7, %v733_v5  ;;  %v496_v18 = vor.u32 %v494_v9, %v493_v15  ;;  %v497_v24 = vrot.slane %v493_v15, 4  ;;  %v338_v36 = vld [vmem:[%s2898_s13 + $0x4c] sm:$0xf]  ;;  %v2657_v40 = vld [vmem:[%s3737_s1 + $0x10] ss:$0 sps:$4 sm:$0x33]  }
  0x4e   : > { %1451 = vrot.lane.b32.xlu0 %v3010_v12, %s2748_s11  ;;  %732 = vst.msk [vmem:[#allocation2 + $0x64] sm:$0xf] %vm263_vm0, %v488_v13  ;;  %735 = vst [vmem:[#allocation2 + $0x68] sm:$0x1] %v734_v14  ;;  %v1029_v31 = vor.u32 %v1028_v22, %v1024_v20  ;;  %v1033_v32 = vrot.slane %v1031_v21, 1  ;;  %v1212_v37 = vrot.slane %v3049_v3, 1 }
  0x4f   : > { %1171 = vrot.lane.b32.xlu1 %v3010_v12, %s2742_s15  ;;  %v501_v12 = vrot.slane %v499_v10, 7  ;;  %v737_v27 = vsel %vm2913_vm8, %v496_v18, %v736_v19  ;;  %v1213_v38 = vrot.slane %v2642_v11, 1  ;;  %v508_v39 = vshrl.u32 %v337_v30, 16  ;;  %v3092_v41 = vld [vmem:[#allocation2 + $0x44] ss:$0 sps:$4 sm:$0x11]  }
  0x50   : > { %738 = vst [vmem:[#allocation2 + $0x6c] sm:$0xf] %v737_v27  ;;  %v511_v44 = vshll.u32 %v337_v30, 16  ;;  %v516_v45 = vshrl.u32 %v338_v36, 16  ;;  %v743_v47 = vld [vmem:[#allocation2 + $0x78] sm:$0xf]  ;;  %v3097_v49 = vsel %vm974_vm2, %v1029_v31, %v1033_v32 }
  0x51   : > { %v504_v29 = vor.u32 %v502_v25, %v501_v12  ;;  %v510_v50 = vrot.slane %v508_v39, 7  ;;  %v519_v51 = vshll.u32 %v338_v36, 16  ;;  %v747_v53 = vld [vmem:[#allocation2 + $0x80] sm:$0x1]  ;;  %v3103_v54 = vsel %vm1199_vm6, %v1212_v37, %v1213_v38  ;;  %v339_v57 = vld [vmem:[%s2898_s13 + $0x50] sm:$0xf] }
  0x52   : > { %1488 = vrot.lane.b32.xlu0 %v3058_v48, %s2746_s29  ;;  %v518_v52 = vrot.slane %v516_v45, 7  ;;  %v1043_v58 = vshll.u32 %v3092_v41, 16  ;;  %vm1842_vm10 = vcmask 1041408   ;;  %v340_v61 = vld [vmem:[%s2898_s13 + $0x54] sm:$0xf]  ;;  %v1036_v62 = vshrl.u32 %v3078_v33, 16 }
  0x53   : > { %1173 = vrot.lane.b32.xlu1 %v3022_v26, %s2742_s15  ;;  %v505_v34 = vsel %vm2906_vm7, %v497_v24, %v504_v29  ;;  %v513_v55 = vor.u32 %v511_v44, %v510_v50  ;;  %v514_v56 = vrot.slane %v510_v50, 4  ;;  %2580 = vmatprep.subr.msk.bf16.mxu0 %vm1842_vm10, %v2657_v40  ;;  %v1844_v0 = vsel %vm1842_vm10, %v2657_v40, 0  ;;  %v341_v7 = vld [vmem:[%s2898_s13 + $0x58] sm:$0xf]  ;;  %v750_v15 = vld [vmem:[#allocation2 + $0x84] sm:$0xf] }
  0x54   : > { %739 = vst.msk [vmem:[#allocation2 + $0x70] sm:$0xf] %vm263_vm0, %v505_v34  ;;  %v521_v59 = vor.u32 %v519_v51, %v518_v52  ;;  %v523_v60 = vrot.slane %v518_v52, 4  ;;  %2581 = vmatprep.subr.msk.bf16.mxu1 %vm1842_vm10, %v2657_v40  ;;  %2524 = vmatpush3.bf16.msra.mxu0 %v1844_v0  ;;  %v525_v5 = vshrl.u32 %v339_v57, 16  ;;  %v528_v6 = vshll.u32 %v339_v57, 16  ;;  %v3141_v36 = vld [vmem:[#allocation2 + $0x48] sm:$0xff]  }
  0x55   : > { %2579 = vmatpush3.bf16.msra.mxu1 %v1844_v0  ;;  %v533_v8 = vshrl.u32 %v340_v61, 16  ;;  %v1045_v9 = vrot.slane %v1043_v58, 1  ;;  %v536_v14 = vshll.u32 %v340_v61, 16  ;;  %v542_v17 = vshrl.u32 %v341_v7, 16  ;;  %v342_v20 = vld [vmem:[%s2898_s13 + $0x5c] sm:$0xf] }
  0x56   : > { %1252 = vrot.lane.b32.xlu0 %v3002_v2, %s2741_s14  ;;  %v506_v2 = vrot.slane %v501_v12, 4  ;;  %v522_v1 = vsel %vm2906_vm7, %v514_v56, %v521_v59  ;;  %v748_v4 = vsel %vm2929_vm9, %v523_v60, %v747_v53  ;;  %v527_v10 = vrot.slane %v525_v5, 7  ;;  %v754_v12 = vld [vmem:[#allocation2 + $0x8c] sm:$0x1]  ;;  %v343_v27 = vld [vmem:[%s2898_s13 + $0x60] sm:$0xf] }
  0x57   : > { %1254 = vrot.lane.b32.xlu1 %v3058_v48, %s2741_s14  ;;  %746 = vst.msk [vmem:[#allocation2 + $0x7c] sm:$0xf] %vm263_vm0, %v522_v1  ;;  %749 = vst [vmem:[#allocation2 + $0x80] sm:$0x1] %v748_v4  ;;  %v535_v13 = vrot.slane %v533_v8, 7  ;;  %v544_v22 = vrot.slane %v542_v17, 7 }
  0x58   : > { %v741_v42 = vsel %vm2929_vm9, %v506_v2, %v740_v35  ;;  %v530_v18 = vor.u32 %v528_v6, %v527_v10  ;;  %v531_v19 = vrot.slane %v527_v10, 4  ;;  %v545_v25 = vshll.u32 %v341_v7, 16  ;;  %v757_v32 = vld [vmem:[#allocation2 + $0x90] sm:$0xf]  ;;  %v344_v2 = vld [vmem:[%s2898_s13 + $0x64] sm:$0xf] }
  0x59   : > { %742 = vst [vmem:[#allocation2 + $0x74] sm:$0x1] %v741_v42  ;;  %v540_v21 = vrot.slane %v535_v13, 4  ;;  %v550_v31 = vshrl.u32 %v342_v20, 16  ;;  %v553_v35 = vshll.u32 %v342_v20, 16  ;;  %v548_v37 = vrot.slane %v544_v22, 4 }
  0x5a   : > { %1289 = vrot.lane.b32.xlu0 %v2978_v43, %s2743_s16  ;;  %v1038_v43 = vshll.u32 %v3078_v33, 16  ;;  %v751_v24 = vsel %vm2913_vm8, %v530_v18, %v750_v15  ;;  %v547_v34 = vor.u32 %v545_v25, %v544_v22  ;;  %v559_v39 = vshrl.u32 %v343_v27, 16  ;;  %v761_v45 = vld [vmem:[#allocation2 + $0x98] sm:$0x1]  ;;  %v764_v59 = vld [vmem:[#allocation2 + $0x9c] sm:$0xf] }
  0x5b   : > { %1291 = vrot.lane.b32.xlu1 %v3049_v3, %s2743_s16  ;;  %752 = vst [vmem:[#allocation2 + $0x84] sm:$0xf] %v751_v24  ;;  %v552_v38 = vrot.slane %v550_v31, 7  ;;  %v1215_v40 = vrot.slane %v3078_v33, 1  ;;  %v1216_v42 = vrot.slane %v3092_v41, 1  ;;  %v567_v52 = vshrl.u32 %v344_v2, 16 }
  0x5c   : > { %v1040_v63 = vrot.slane %v1038_v43, 1  ;;  %v758_v44 = vsel %vm2913_vm8, %v547_v34, %v757_v32  ;;  %v561_v51 = vrot.slane %v559_v39, 7  ;;  %v570_v53 = vshll.u32 %v344_v2, 16  ;;  %v3153_v56 = vld [vmem:[#allocation2 + $0x50] ss:$0 sps:$4 sm:$0x11]  }
  0x5d   : > { %v555_v43 = vor.u32 %v553_v35, %v552_v38  ;;  %759 = vst [vmem:[#allocation2 + $0x90] sm:$0xf] %v758_v44  ;;  %v557_v50 = vrot.slane %v552_v38, 4  ;;  %v1050_v57 = vshll.u32 %v3141_v36, 16  ;;  %v3163_v60 = vsel %vm1199_vm6, %v1215_v40, %v1216_v42  ;;  %v346_v6 = vld [vmem:[%s2898_s13 + $0x6c] sm:$0xf] }
  0x5e   : > { %1336 = vrot.lane.b32.xlu0 %v3022_v26, %s2747_s10  ;;  %v744_v26 = vsel %vm2913_vm8, %v513_v55, %v743_v47  ;;  %v1041_v11 = vor.u32 %v1040_v63, %v1036_v62  ;;  %v562_v47 = vshll.u32 %v343_v27, 16  ;;  %v345_v55 = vld [vmem:[%s2898_s13 + $0x68] sm:$0xf]  ;;  %v565_v62 = vrot.slane %v561_v51, 4  ;;  %v3186_v24 = vld [vmem:[#allocation2 + $0x54] sm:$0xff]  }
  0x5f   : > { %1338 = vrot.lane.b32.xlu1 %v3097_v49, %s2747_s10  ;;  %745 = vst [vmem:[#allocation2 + $0x78] sm:$0xf] %v744_v26  ;;  %v556_v41 = vsel %vm2906_vm7, %v548_v37, %v555_v43  ;;  %v762_v58 = vsel %vm2929_vm9, %v557_v50, %v761_v45  ;;  %v569_v63 = vrot.slane %v567_v52, 7  ;;  %v768_v26 = vld [vmem:[#allocation2 + $0xa4] sm:$0x1]  ;;  %v576_v0 = vshrl.u32 %v345_v55, 16 }
  0x60   : > { %v3132_v29 = vsel %vm974_vm2, %v1041_v11, %v1045_v9  ;;  %760 = vst.msk [vmem:[#allocation2 + $0x94] sm:$0xf] %vm263_vm0, %v556_v41  ;;  %763 = vst [vmem:[#allocation2 + $0x98] sm:$0x1] %v762_v58  ;;  %v564_v61 = vor.u32 %v562_v47, %v561_v51  ;;  %v1048_v8 = vshrl.u32 %v3141_v36, 16  ;;  %v1052_v9 = vrot.slane %v1050_v57, 1 }
  0x61   : > { %v572_v1 = vor.u32 %v570_v53, %v569_v63  ;;  %v574_v5 = vrot.slane %v569_v63, 4  ;;  %v578_v7 = vrot.slane %v576_v0, 7  ;;  %v584_v15 = vshrl.u32 %v346_v6, 16  ;;  %v771_v18 = vld [vmem:[#allocation2 + $0xa8] sm:$0xf] }
  0x62   : > { %1371 = vrot.lane.b32.xlu0 %v3058_v48, %s2745_s20  ;;  %v538_v48 = vor.u32 %v536_v14, %v535_v13  ;;  %v765_v4 = vsel %vm2913_vm8, %v564_v61, %v764_v59  ;;  %v347_v13 = vld [vmem:[%s2898_s13 + $0x70] sm:$0xf]  ;;  %v579_v14 = vshll.u32 %v345_v55, 16  ;;  %v587_v17 = vshll.u32 %v346_v6, 16  ;;  %v778_v38 = vld [vmem:[#allocation2 + $0xb4] sm:$0xf] }
  0x63   : > { %1373 = vrot.lane.b32.xlu1 %v3103_v54, %s2745_s20  ;;  %766 = vst [vmem:[#allocation2 + $0x9c] sm:$0xf] %v765_v4  ;;  %v573_v10 = vsel %vm2906_vm7, %v565_v62, %v572_v1  ;;  %v769_v11 = vsel %vm2929_vm9, %v574_v5, %v768_v26  ;;  %v1053_v22 = vor.u32 %v1052_v9, %v1048_v8  ;;  %v582_v25 = vrot.slane %v578_v7, 4  ;;  %v775_v34 = vld [vmem:[#allocation2 + $0xb0] sm:$0x1]  ;;  %v3228_v9 = vld [vmem:[#allocation2 + $0x60] sm:$0xff]  }
  0x64   : > { %v539_v30 = vsel %vm2906_vm7, %v531_v19, %v538_v48  ;;  %767 = vst.msk [vmem:[#allocation2 + $0xa0] sm:$0xf] %vm263_vm0, %v573_v10  ;;  %770 = vst [vmem:[#allocation2 + $0xa4] sm:$0x1] %v769_v11  ;;  %v348_v19 = vld [vmem:[%s2898_s13 + $0x74] sm:$0xf]  ;;  %v581_v48 = vor.u32 %v579_v14, %v578_v7 }
  0x65   : > { %753 = vst.msk [vmem:[#allocation2 + $0x88] sm:$0xf] %vm263_vm0, %v539_v30  ;;  %v596_v30 = vshll.u32 %v347_v13, 16  ;;  %v1219_v39 = vrot.slane %v3153_v56, 1  ;;  %v1062_v40 = vshll.u32 %v3186_v24, 16  ;;  %v604_v50 = vshll.u32 %v348_v19, 16 }
  0x66   : > { %1408 = vrot.lane.b32.xlu0 %v3049_v3, %s2744_s17  ;;  %v755_v3 = vsel %vm2929_vm9, %v540_v21, %v754_v12  ;;  %v593_v12 = vshrl.u32 %v347_v13, 16  ;;  %v586_v21 = vrot.slane %v584_v15, 7  ;;  %v772_v32 = vsel %vm2913_vm8, %v581_v48, %v771_v18  ;;  %v2648_v44 = vld [vmem:[#allocation2 + $0x5c] ss:$0 sps:$4 sm:$0x11]  }
  0x67   : > { %1410 = vrot.lane.b32.xlu1 %v3078_v33, %s2744_s17  ;;  %756 = vst [vmem:[#allocation2 + $0x8c] sm:$0x1] %v755_v3  ;;  %v601_v3 = vshrl.u32 %v348_v19, 16  ;;  %773 = vst [vmem:[#allocation2 + $0xa8] sm:$0xf] %v772_v32  ;;  %v1060_v55 = vshrl.u32 %v3186_v24, 16 }
  0x68   : > { %v595_v27 = vrot.slane %v593_v12, 7  ;;  %v589_v31 = vor.u32 %v587_v17, %v586_v21  ;;  %v591_v35 = vrot.slane %v586_v21, 4  ;;  %v782_v53 = vld [vmem:[#allocation2 + $0xbc] sm:$0x1]  ;;  %v1064_v41 = vrot.slane %v1062_v40, 1 }
  0x69   : > { %v603_v43 = vrot.slane %v601_v3, 7  ;;  %v1067_v58 = vshll.u32 %v2648_v44, 16  ;;  %v349_v63 = vld [vmem:[%s2898_s13 + $0x78] sm:$0xf]  ;;  %v350_v26 = vld [vmem:[%s2898_s13 + $0x7c] sm:$0xf] }
  0x6a   : > { %1455 = vrot.lane.b32.xlu0 %v3097_v49, %s2748_s11  ;;  %v598_v37 = vor.u32 %v596_v30, %v595_v27  ;;  %v590_v42 = vsel %vm2906_vm7, %v582_v25, %v589_v31  ;;  %v776_v45 = vsel %vm2929_vm9, %v591_v35, %v775_v34  ;;  %v599_v47 = vrot.slane %v595_v27, 4  ;;  %v785_v14 = vld [vmem:[#allocation2 + $0xc0] sm:$0xf]  ;;  %v789_v12 = vld [vmem:[#allocation2 + $0xc8] sm:$0x1]  ;;  %v3246_v30 = vld [vmem:[#allocation2 + $0x6c] sm:$0xff]  }
  0x6b   : > { %1457 = vrot.lane.b32.xlu1 %v3132_v29, %s2748_s11  ;;  %774 = vst.msk [vmem:[#allocation2 + $0xac] sm:$0xf] %vm263_vm0, %v590_v42  ;;  %777 = vst [vmem:[#allocation2 + $0xb0] sm:$0x1] %v776_v45  ;;  %v606_v52 = vor.u32 %v604_v50, %v603_v43  ;;  %v1065_v61 = vor.u32 %v1064_v41, %v1060_v55  ;;  %v1069_v62 = vrot.slane %v1067_v58, 1  ;;  %v610_v1 = vshrl.u32 %v349_v63, 16 }
  0x6c   : > { %v779_v51 = vsel %vm2913_vm8, %v598_v37, %v778_v38  ;;  %v618_v4 = vshrl.u32 %v350_v26, 16  ;;  %v613_v5 = vshll.u32 %v349_v63, 16  ;;  %v1221_v6 = vrot.slane %v3186_v24, 1  ;;  %v2652_v32 = vld [vmem:[#allocation2 + $0x74] ss:$0 sps:$4 sm:$0x11]  }
  0x6d   : > { %780 = vst [vmem:[#allocation2 + $0xb4] sm:$0xf] %v779_v51  ;;  %v607_v59 = vsel %vm2906_vm7, %v599_v47, %v606_v52  ;;  %v1070_v0 = vsel %vm974_vm2, %v1065_v61, %v1069_v62  ;;  %v621_v8 = vshll.u32 %v350_v26, 16  ;;  %v1074_v48 = vshll.u32 %v3228_v9, 16  ;;  %v3269_v52 = vld [vmem:[#allocation2 + $0x78] sm:$0xff]   ;;  %v2672_v26 = vld [vmem:[#allocation2] sm:$0xff]  }
  0x6e   : > { %1490 = vrot.lane.b32.xlu0 %v3103_v54, %s2746_s29  ;;  %781 = vst.msk [vmem:[#allocation2 + $0xb8] sm:$0xf] %vm263_vm0, %v607_v59  ;;  %v620_v7 = vrot.slane %v618_v4, 7  ;;  %v1072_v23 = vshrl.u32 %v3228_v9, 16  ;;  %v1224_v3 = vrot.slane %v3228_v9, 1  ;;  %v1086_v34 = vshll.u32 %v3246_v30, 16 }
  0x6f   : > { %1175 = vrot.lane.b32.xlu1 %v3097_v49, %s2742_s15  ;;  %v1055_v49 = vshll.u32 %v3153_v56, 16  ;;  %v608_v56 = vrot.slane %v603_v43, 4  ;;  %v1084_v35 = vshrl.u32 %v3246_v30, 16  ;;  %v1091_v38 = vshll.u32 %v2652_v32, 16 }
  0x70   : > { %v623_v13 = vor.u32 %v621_v8, %v620_v7  ;;  %v625_v17 = vrot.slane %v620_v7, 4  ;;  %v1088_v37 = vrot.slane %v1086_v34, 1  ;;  %v1227_v43 = vrot.slane %v3246_v30, 1 }
  0x71   : > { %v1057_v20 = vrot.slane %v1055_v49, 1  ;;  %v1222_v49 = vrot.slane %v2648_v44, 1  ;;  %v1093_v42 = vrot.slane %v1091_v38, 1  ;;  %v1228_v50 = vrot.slane %v2652_v32, 1 }
  0x72   : > { %1492 = vrot.lane.b32.xlu0 %v3163_v60, %s2746_s29  ;;  %v790_v21 = vsel %vm2929_vm9, %v625_v17, %v789_v12  ;;  %v1089_v40 = vor.u32 %v1088_v37, %v1084_v35  ;;  %v1098_v41 = vshll.u32 %v3269_v52, 16  ;;  %vm1518_vm11 = vcmask 31744  }
  0x73   : > { %1177 = vrot.lane.b32.xlu1 %v3132_v29, %s2742_s15  ;;  %v1058_v2 = vsel %vm974_vm2, %v1053_v22, %v1057_v20  ;;  %v1223_v18 = vsel %vm1199_vm6, %v1221_v6, %v1222_v49  ;;  %v2650_v20 = vld [vmem:[#allocation2 + $0x68] ss:$0 sps:$4 sm:$0x11]   ;;  %791 = vst [vmem:[#allocation2 + $0xc8] sm:$0x1] %v790_v21  ;;  %v1076_v22 = vrot.slane %v1074_v48, 1  ;;  %v1229_v55 = vsel %vm1199_vm6, %v1227_v43, %v1228_v50 }
  0x74   : > { %v1079_v16 = vshll.u32 %v2650_v20, 16  ;;  %v1225_v31 = vrot.slane %v2650_v20, 1  ;;  %v1094_v47 = vsel %vm974_vm2, %v1089_v40, %v1093_v42  ;;  %v1100_v61 = vrot.slane %v1098_v41, 1  ;;  %v3322_v50 = vld [vmem:[#allocation2 + $0x90] sm:$0xff]  }
  0x75   : > { %v1077_v25 = vor.u32 %v1076_v22, %v1072_v23  ;;  %vm1551_vm12 = vcmask 64512   ;;  %vm1584_vm13 = vcmask 97280   ;;  %vm1617_vm14 = vcmask 130048  }
  0x76   : > { %1256 = vrot.lane.b32.xlu0 %v3103_v54, %s2741_s14  ;;  %v1218_v54 = vrot.slane %v3141_v36, 1  ;;  %v1081_v27 = vrot.slane %v1079_v16, 1  ;;  %vm1650_vm15 = vcmask 162816   ;;  %vm1716_vm1 = vcmask 228352  }
  0x77   : > { %1258 = vrot.lane.b32.xlu1 %v3163_v60, %s2741_s14  ;;  %vm1749_vm3 = vcmask 261120   ;;  %vm1809_vm4 = vcmask 293888   ;;  %vm2322_vm5 = vcmask 73728  }
  0x78   : > { %v1220_v57 = vsel %vm1199_vm6, %v1218_v54, %v1219_v39  ;;  %v1082_v46 = vsel %vm974_vm2, %v1077_v25, %v1081_v27  ;;  %v1226_v54 = vsel %vm1199_vm6, %v1224_v3, %v1225_v31 }
  0x7a   : > { %1293 = vrot.lane.b32.xlu0 %v3078_v33, %s2743_s16 }
  0x7b   : > { %1295 = vrot.lane.b32.xlu1 %v3141_v36, %s2743_s16 }
  0x7e   : > { %1340 = vrot.lane.b32.xlu0 %v3132_v29, %s2747_s10  ;;  %v783_v29 = vsel %vm2929_vm9, %v608_v56, %v782_v53 }
  0x7f   : > { %1342 = vrot.lane.b32.xlu1 %v1058_v2, %s2747_s10  ;;  %784 = vst [vmem:[#allocation2 + $0xbc] sm:$0x1] %v783_v29  ;;  %v1096_v29 = vshrl.u32 %v3269_v52, 16 }
  0x81   : > { %v1101_v4 = vor.u32 %v1100_v61, %v1096_v29 }
  0x82   : > { %1375 = vrot.lane.b32.xlu0 %v3163_v60, %s2745_s20  ;;  %v612_v60 = vrot.slane %v610_v1, 7 }
  0x83   : > { %1377 = vrot.lane.b32.xlu1 %v1220_v57, %s2745_s20 }
  0x84   : > { %v615_v10 = vor.u32 %v613_v5, %v612_v60  ;;  %v616_v11 = vrot.slane %v612_v60, 4  ;;  %v3281_v5 = vld [vmem:[#allocation2 + $0x84] sm:$0xff]  }
  0x85   : > { %v1108_v25 = vshrl.u32 %v3281_v5, 16 }
  0x86   : > { %1412 = vrot.lane.b32.xlu0 %v3141_v36, %s2744_s17  ;;  %v786_v15 = vsel %vm2913_vm8, %v615_v10, %v785_v14  ;;  %v624_v19 = vsel %vm2906_vm7, %v616_v11, %v623_v13  ;;  %v1230_v11 = vrot.slane %v3269_v52, 1 }
  0x87   : > { %1414 = vrot.lane.b32.xlu1 %v3186_v24, %s2744_s17  ;;  %787 = vst [vmem:[#allocation2 + $0xc0] sm:$0xf] %v786_v15  ;;  %788 = vst.msk [vmem:[#allocation2 + $0xc4] sm:$0xf] %vm263_vm0, %v624_v19  ;;  %vm1683_vm0 = vcmask 195584   ;;  %v1110_v19 = vshll.u32 %v3281_v5, 16 }
  0x89   : > { %v1112_v27 = vrot.slane %v1110_v19, 1 }
  0x8a   : > { %1459 = vrot.lane.b32.xlu0 %v1058_v2, %s2748_s11 }
  0x8b   : > { %1461 = vrot.lane.b32.xlu1 %v1070_v0, %s2748_s11  ;;  %v1113_v37 = vor.u32 %v1112_v27, %v1108_v25 }
  0x8e   : > { %1494 = vrot.lane.b32.xlu0 %v1220_v57, %s2746_s29 }
  0x8f   : > { %1179 = vrot.lane.b32.xlu1 %v1058_v2, %s2742_s15 }
  0x92   : > { %1496 = vrot.lane.b32.xlu0 %v1223_v18, %s2746_s29 }
  0x93   : > { %1181 = vrot.lane.b32.xlu1 %v1070_v0, %s2742_s15 }
  0x96   : > { %1260 = vrot.lane.b32.xlu0 %v1220_v57, %s2741_s14  ;;  %v2656_v57 = vld [vmem:[#allocation2 + $0x80] ss:$0 sps:$4 sm:$0x11]  }
  0x97   : > { %1262 = vrot.lane.b32.xlu1 %v1223_v18, %s2741_s14  ;;  %v1103_v62 = vshll.u32 %v2656_v57, 16  ;;  %v1231_v13 = vrot.slane %v2656_v57, 1  ;;  %v1122_v57 = vshll.u32 %v3322_v50, 16 }
  0x99   : > { %v1105_v60 = vrot.slane %v1103_v62, 1  ;;  %v1232_v16 = vsel %vm1199_vm6, %v1230_v11, %v1231_v13  ;;  %v1124_v29 = vrot.slane %v1122_v57, 1 }
  0x9a   : > { %1297 = vrot.lane.b32.xlu0 %v3186_v24, %s2743_s16 }
  0x9b   : > { %1299 = vrot.lane.b32.xlu1 %v3228_v9, %s2743_s16  ;;  %v1106_v17 = vsel %vm974_vm2, %v1101_v4, %v1105_v60  ;;  %v2673_v60 = vld [vmem:[#allocation2 + $0x18] sm:$0xff]  }
  0x9e   : > { %1344 = vrot.lane.b32.xlu0 %v1070_v0, %s2747_s10 }
  0x9f   : > { %1346 = vrot.lane.b32.xlu1 %v1082_v46, %s2747_s10  ;;  %v1249_v2 = vpop.permute.xlu1 %1248 }
  0xa1   : > { %v1168_v39 = vpop.permute.xlu0 %1167 }
  0xa2   : > { %1379 = vrot.lane.b32.xlu0 %v1223_v18, %s2745_s20  ;;  %v1520_v0 = vsel %vm1518_vm11, %v2672_v26, %v1168_v39  ;;  %v2659_v18 = vld [vmem:[#allocation2 + $0x8c] ss:$0 sps:$4 sm:$0x11]  }
  0xa3   : > { %1381 = vrot.lane.b32.xlu1 %v1226_v54, %s2745_s20  ;;  %v1553_v8 = vsel %vm1551_vm12, %v1520_v0, %v1249_v2 }
  0xa6   : > { %1416 = vrot.lane.b32.xlu0 %v3228_v9, %s2744_s17  ;;  %v1288_v44 = vpop.permute.xlu1 %1287 }
  0xa7   : > { %1418 = vrot.lane.b32.xlu1 %v3246_v30, %s2744_s17 }
  0xa8   : > { %v1286_v45 = vpop.permute.xlu0 %1285 }
  0xaa   : > { %1463 = vrot.lane.b32.xlu0 %v1082_v46, %s2748_s11 }
  0xab   : > { %1465 = vrot.lane.b32.xlu1 %v1094_v47, %s2748_s11 }
  0xac   : > { %v1405_v51 = vpop.permute.xlu0 %1404 }
  0xad   : > { %v1407_v53 = vpop.permute.xlu1 %1406 }
  0xae   : > { %1498 = vrot.lane.b32.xlu0 %v1226_v54, %s2746_s29 }
  0xaf   : > { %1183 = vrot.lane.b32.xlu1 %v1082_v46, %s2742_s15  ;;  %v1115_v46 = vshll.u32 %v2659_v18, 16 }
  0xb0   : > { %v1368_v56 = vpop.permute.xlu0 %1367 }
  0xb1   : > { %v1251_v58 = vpop.permute.xlu1 %1250  ;;  %v1117_v38 = vrot.slane %v1115_v46, 1 }
  0xb2   : > { %1500 = vrot.lane.b32.xlu0 %v1229_v55, %s2746_s29 }
  0xb3   : > { %1185 = vrot.lane.b32.xlu1 %v1094_v47, %s2742_s15  ;;  %v1118_v42 = vsel %vm974_vm2, %v1113_v37, %v1117_v38 }
  0xb4   : > { %v1487_v59 = vpop.permute.xlu0 %1486 }
  0xb5   : > { %v1370_v63 = vpop.permute.xlu1 %1369 }
  0xb6   : > { %1264 = vrot.lane.b32.xlu0 %v1226_v54, %s2741_s14 }
  0xb7   : > { %1266 = vrot.lane.b32.xlu1 %v1229_v55, %s2741_s14 }
  0xb8   : > { %v1170_v1 = vpop.permute.xlu0 %1169 }
  0xb9   : > { %v1335_v6 = vpop.permute.xlu1 %1334  ;;  %v1522_v49 = vsel %vm1518_vm11, %v2962_v28, %v1170_v1  ;;  %v1586_v28 = vsel %vm1584_vm13, %v1553_v8, %v1286_v45  ;;  %v1233_v45 = vrot.slane %v3281_v5, 1  ;;  %v3333_v1 = vld [vmem:[#allocation2 + $0x9c] sm:$0xff]  }
  0xba   : > { %v1555_v7 = vsel %vm1551_vm12, %v1522_v49, %v1251_v58  ;;  %1301 = vrot.lane.b32.xlu0 %v3246_v30, %s2743_s16 }
  0xbb   : > { %v1588_v10 = vsel %vm1584_vm13, %v1555_v7, %v1288_v44  ;;  %1303 = vrot.lane.b32.xlu1 %v3269_v52, %s2743_s16  ;;  %v1236_v7 = vrot.slane %v3322_v50, 1 }
  0xbc   : > { %v1621_v14 = vsel %vm1617_vm14, %v1588_v10, %v1335_v6  ;;  %v1333_v15 = vpop.permute.xlu0 %1332 }
  0xbd   : > { %v1454_v12 = vpop.permute.xlu1 %1453  ;;  %v1619_v20 = vsel %vm1617_vm14, %v1586_v28, %v1333_v15  ;;  %v1654_v48 = vsel %vm1650_vm15, %v1621_v14, %v1370_v63  ;;  %v2663_v28 = vld [vmem:[#allocation2 + $0xa4] ss:$0 sps:$4 sm:$0x11]   ;;  %v1134_v14 = vshll.u32 %v3333_v1, 16 }
  0xbe   : > { %v1652_v21 = vsel %vm1650_vm15, %v1619_v20, %v1368_v56  ;;  %1348 = vrot.lane.b32.xlu0 %v1094_v47, %s2747_s10  ;;  %v1687_v3 = vsel %vm1683_vm0, %v1654_v48, %v1407_v53  ;;  %v1234_v47 = vrot.slane %v2659_v18, 1  ;;  %v2661_v56 = vld [vmem:[#allocation2 + $0x98] ss:$0 sps:$4 sm:$0x11]   ;;  %v2674_v18 = vld [vmem:[#allocation2 + $0x24] sm:$0xff]   ;;  %v1139_v46 = vshll.u32 %v2663_v28, 16 }
  0xbf   : > { %1350 = vrot.lane.b32.xlu1 %v1106_v17, %s2747_s10  ;;  %v1685_v23 = vsel %vm1683_vm0, %v1652_v21, %v1405_v51  ;;  %v1720_v54 = vsel %vm1716_vm1, %v1687_v3, %v1454_v12  ;;  %v1127_v61 = vshll.u32 %v2661_v56, 16  ;;  %v1237_v8 = vrot.slane %v2661_v56, 1 }
  0xc0   : > { %v1452_v22 = vpop.permute.xlu0 %1451  ;;  %v1235_v53 = vsel %vm1199_vm6, %v1233_v45, %v1234_v47  ;;  %v1136_v27 = vrot.slane %v1134_v14, 1  ;;  %v1239_v47 = vrot.slane %v3333_v1, 1 }
  0xc1   : > { %v1172_v31 = vpop.permute.xlu1 %1171  ;;  %v1718_v32 = vsel %vm1716_vm1, %v1685_v23, %v1452_v22  ;;  %v1129_v0 = vrot.slane %v1127_v61, 1  ;;  %v1238_v21 = vsel %vm1199_vm6, %v1236_v7, %v1237_v8  ;;  %v1132_v23 = vshrl.u32 %v3333_v1, 16  ;;  %v2675_v7 = vld [vmem:[#allocation2 + $0x30] sm:$0xff]  }
  0xc2   : > { %1383 = vrot.lane.b32.xlu0 %v1229_v55, %s2745_s20  ;;  %v1751_v34 = vsel %vm1749_vm3, %v1718_v32, %v1487_v59  ;;  %v1120_v59 = vshrl.u32 %v3322_v50, 16  ;;  %v1524_v6 = vsel %vm1518_vm11, %v2673_v60, %v1172_v31 }
  0xc3   : > { %1385 = vrot.lane.b32.xlu1 %v1232_v16, %s2745_s20  ;;  %2525 = vmatprep.mubr.msk.bf16.mxu0 %vm1809_vm4, %v1751_v34  ;;  %v1137_v38 = vor.u32 %v1136_v27, %v1132_v23 }
  0xc4   : > { %v1489_v35 = vpop.permute.xlu0 %1488  ;;  %v1125_v26 = vor.u32 %v1124_v29, %v1120_v59 }
  0xc5   : > { %v1174_v2 = vpop.permute.xlu1 %1173  ;;  %v1753_v39 = vsel %vm1749_vm3, %v1720_v54, %v1489_v35 }
  0xc6   : > { %1420 = vrot.lane.b32.xlu0 %v3269_v52, %s2744_s17  ;;  %2526 = vmatmul.mubr.msk.bf16.vlgmr.msra.gmra.mrb[0].mxu0 %vm1809_vm4, %v1753_v39  ;;  %v1130_v13 = vsel %vm974_vm2, %v1125_v26, %v1129_v0  ;;  %v1526_v19 = vsel %vm1518_vm11, %v2674_v18, %v1174_v2  ;;  %v1141_v2 = vrot.slane %v1139_v46, 1 }
  0xc7   : > { %1422 = vrot.lane.b32.xlu1 %v3281_v5, %s2744_s17 }
  0xc8   : > { %v1253_v40 = vpop.permute.xlu0 %1252 }
  0xc9   : > { %v1255_v44 = vpop.permute.xlu1 %1254  ;;  %v1557_v49 = vsel %vm1551_vm12, %v1524_v6, %v1253_v40  ;;  %v3385_v6 = vld [vmem:[#allocation2 + $0xb4] sm:$0xff]  }
  0xca   : > { %1467 = vrot.lane.b32.xlu0 %v1106_v17, %s2748_s11  ;;  %v1559_v20 = vsel %vm1551_vm12, %v1526_v19, %v1255_v44  ;;  %v1142_v44 = vsel %vm974_vm2, %v1137_v38, %v1141_v2  ;;  %v1158_v18 = vshll.u32 %v3385_v6, 16 }
  0xcb   : > { %1469 = vrot.lane.b32.xlu1 %v1118_v42, %s2748_s11 }
  0xcc   : > { %v1290_v43 = vpop.permute.xlu0 %1289 }
  0xcd   : > { %v1292_v51 = vpop.permute.xlu1 %1291  ;;  %v1590_v10 = vsel %vm1584_vm13, %v1557_v49, %v1290_v43  ;;  %v1240_v43 = vrot.slane %v2663_v28, 1 }
  0xce   : > { %1502 = vrot.lane.b32.xlu0 %v1232_v16, %s2746_s29  ;;  %v1592_v22 = vsel %vm1584_vm13, %v1559_v20, %v1292_v51 }
  0xcf   : > { %1187 = vrot.lane.b32.xlu1 %v1106_v17, %s2742_s15  ;;  %v1241_v56 = vsel %vm1199_vm6, %v1239_v47, %v1240_v43  ;;  %v1245_v43 = vrot.slane %v3385_v6, 1 }
  0xd0   : > { %v1337_v55 = vpop.permute.xlu0 %1336 }
  0xd1   : > { %v1339_v41 = vpop.permute.xlu1 %1338  ;;  %v1623_v15 = vsel %vm1617_vm14, %v1590_v10, %v1337_v55 }
  0xd2   : > { %1504 = vrot.lane.b32.xlu0 %v1235_v53, %s2746_s29  ;;  %v1625_v3 = vsel %vm1617_vm14, %v1592_v22, %v1339_v41  ;;  %v2665_v41 = vld [vmem:[#allocation2 + $0xb0] ss:$0 sps:$4 sm:$0x11]  }
  0xd3   : > { %1189 = vrot.lane.b32.xlu1 %v1118_v42, %s2742_s15 }
  0xd4   : > { %v1372_v58 = vpop.permute.xlu0 %1371 }
  0xd5   : > { %v1374_v62 = vpop.permute.xlu1 %1373  ;;  %v1656_v12 = vsel %vm1650_vm15, %v1623_v15, %v1372_v58 }
  0xd6   : > { %1268 = vrot.lane.b32.xlu0 %v1232_v16, %s2741_s14  ;;  %v1658_v34 = vsel %vm1650_vm15, %v1625_v3, %v1374_v62 }
  0xd7   : > { %1270 = vrot.lane.b32.xlu1 %v1235_v53, %s2741_s14 }
  0xd8   : > { %v1409_v63 = vpop.permute.xlu0 %1408 }
  0xd9   : > { %v1411_v4 = vpop.permute.xlu1 %1410  ;;  %v1689_v48 = vsel %vm1683_vm0, %v1656_v12, %v1409_v63  ;;  %v1151_v63 = vshll.u32 %v2665_v41, 16 }
  0xda   : > { %1305 = vrot.lane.b32.xlu0 %v3281_v5, %s2743_s16  ;;  %v1691_v54 = vsel %vm1683_vm0, %v1658_v34, %v1411_v4 }
  0xdb   : > { %1307 = vrot.lane.b32.xlu1 %v3322_v50, %s2743_s16  ;;  %v1153_v60 = vrot.slane %v1151_v63, 1 }
  0xdc   : > { %v1456_v11 = vpop.permute.xlu0 %1455 }
  0xdd   : > { %v1458_v17 = vpop.permute.xlu1 %1457  ;;  %v1722_v16 = vsel %vm1716_vm1, %v1689_v48, %v1456_v11 }
  0xde   : > { %1352 = vrot.lane.b32.xlu0 %v1118_v42, %s2747_s10  ;;  %v1724_v35 = vsel %vm1716_vm1, %v1691_v54, %v1458_v17  ;;  %v2667_v17 = vld [vmem:[#allocation2 + $0xbc] ss:$0 sps:$4 sm:$0x11]  }
  0xdf   : > { %1354 = vrot.lane.b32.xlu1 %v1130_v13, %s2747_s10  ;;  %v1163_v3 = vshll.u32 %v2667_v17, 16 }
  0xe0   : > { %v1491_v25 = vpop.permute.xlu0 %1490 }
  0xe1   : > { %v1176_v31 = vpop.permute.xlu1 %1175  ;;  %v1755_v32 = vsel %vm1749_vm3, %v1722_v16, %v1491_v25  ;;  %v1156_v16 = vshrl.u32 %v3385_v6, 16 }
  0xe2   : > { %1387 = vrot.lane.b32.xlu0 %v1235_v53, %s2745_s20  ;;  %2529 = vmatprep.mubr.msk.bf16.mxu0 %vm1809_vm4, %v1755_v32  ;;  %v3374_v53 = vld [vmem:[#allocation2 + $0xa8] sm:$0xff]   ;;  %v1528_v8 = vsel %vm1518_vm11, %v2675_v7, %v1176_v31 }
  0xe3   : > { %1389 = vrot.lane.b32.xlu1 %v1238_v21, %s2745_s20  ;;  %v1146_v58 = vshll.u32 %v3374_v53, 16  ;;  %v1144_v61 = vshrl.u32 %v3374_v53, 16  ;;  %v1242_v11 = vrot.slane %v3374_v53, 1 }
  0xe4   : > { %v1493_v37 = vpop.permute.xlu0 %1492 }
  0xe5   : > { %v1178_v39 = vpop.permute.xlu1 %1177  ;;  %v1757_v40 = vsel %vm1749_vm3, %v1724_v35, %v1493_v37  ;;  %v1148_v62 = vrot.slane %v1146_v58, 1 }
  0xe6   : > { %1424 = vrot.lane.b32.xlu0 %v3322_v50, %s2744_s17  ;;  %2530 = vmatmul.mubr.msk.bf16.gmra.mrb[4].mxu0 %vm1809_vm4, %v1757_v40  ;;  %v1530_v20 = vsel %vm1518_vm11, %v3078_v33, %v1178_v39  ;;  %v1160_v33 = vrot.slane %v1158_v18, 1  ;;  %v1165_v39 = vrot.slane %v1163_v3, 1 }
  0xe7   : > { %1426 = vrot.lane.b32.xlu1 %v3333_v1, %s2744_s17  ;;  %v1149_v4 = vor.u32 %v1148_v62, %v1144_v61 }
  0xe8   : > { %v1257_v42 = vpop.permute.xlu0 %1256  ;;  %v1161_v2 = vor.u32 %v1160_v33, %v1156_v16 }
  0xe9   : > { %v1259_v45 = vpop.permute.xlu1 %1258  ;;  %v1561_v10 = vsel %vm1551_vm12, %v1528_v8, %v1257_v42  ;;  %v1154_v15 = vsel %vm974_vm2, %v1149_v4, %v1153_v60  ;;  %v2670_v8 = vld [vmem:[#allocation2 + $0xcc] sm:$0xff]  }
  0xea   : > { %1471 = vrot.lane.b32.xlu0 %v1130_v13, %s2748_s11 }
  0xeb   : > { %1473 = vrot.lane.b32.xlu1 %v1142_v44, %s2748_s11 }
  0xec   : > { %v1294_v51 = vpop.permute.xlu0 %1293 }
  0xed   : > { %v1296_v55 = vpop.permute.xlu1 %1295  ;;  %v1594_v28 = vsel %vm1584_vm13, %v1561_v10, %v1294_v51  ;;  %v1246_v51 = vrot.slane %v2667_v17, 1 }
  0xee   : > { %1506 = vrot.lane.b32.xlu0 %v1238_v21, %s2746_s29 }
  0xef   : > { %1191 = vrot.lane.b32.xlu1 %v1130_v13, %s2742_s15  ;;  %v1243_v13 = vrot.slane %v2665_v41, 1  ;;  %v1247_v41 = vsel %vm1199_vm6, %v1245_v43, %v1246_v51 }
  0xf0   : > { %v1341_v57 = vpop.permute.xlu0 %1340 }
  0xf1   : > { %v1343_v59 = vpop.permute.xlu1 %1342  ;;  %v1627_v19 = vsel %vm1617_vm14, %v1594_v28, %v1341_v57  ;;  %v1244_v22 = vsel %vm1199_vm6, %v1242_v11, %v1243_v13 }
  0xf2   : > { %1508 = vrot.lane.b32.xlu0 %v1241_v56, %s2746_s29 }
  0xf3   : > { %1193 = vrot.lane.b32.xlu1 %v1142_v44, %s2742_s15 }
  0xf4   : > { %v1376_v29 = vpop.permute.xlu0 %1375 }
  0xf5   : > { %v1378_v26 = vpop.permute.xlu1 %1377  ;;  %v1660_v48 = vsel %vm1650_vm15, %v1627_v19, %v1376_v29  ;;  %v2671_v19 = vld [vmem:[#allocation2 + $0xd4] ss:$0 sps:$4 sm:$0x11]  }
  0xf6   : > { %1272 = vrot.lane.b32.xlu0 %v1238_v21, %s2741_s14  ;;  %v1563_v21 = vsel %vm1551_vm12, %v1530_v20, %v1259_v45  ;;  %v1166_v45 = vsel %vm974_vm2, %v1161_v2, %v1165_v39  ;;  %v1484_v43 = vrot.slane %v2671_v19, 1 }
  0xf7   : > { %1274 = vrot.lane.b32.xlu1 %v1241_v56, %s2741_s14  ;;  %v1596_v25 = vsel %vm1584_vm13, %v1563_v21, %v1296_v55 }
  0xf8   : > { %v1413_v0 = vpop.permute.xlu0 %1412  ;;  %v1629_v31 = vsel %vm1617_vm14, %v1596_v25, %v1343_v59  ;;  %v2669_v59 = vld [vmem:[#allocation2 + $0xc8] ss:$0 sps:$4 sm:$0x11]   ;;  %v1440_v25 = vshrl.u32 %v2670_v8, 16 }
  0xf9   : > { %v1415_v49 = vpop.permute.xlu1 %1414  ;;  %v1693_v23 = vsel %vm1683_vm0, %v1660_v48, %v1413_v0  ;;  %v1662_v54 = vsel %vm1650_vm15, %v1629_v31, %v1378_v26  ;;  %v1328_v0 = vshll.u32 %v2669_v59, 16 }
  0xfa   : > { %1309 = vrot.lane.b32.xlu0 %v3333_v1, %s2743_s16  ;;  %v1695_v35 = vsel %vm1683_vm0, %v1662_v54, %v1415_v49 }
  0xfb   : > { %1311 = vrot.lane.b32.xlu1 %v3374_v53, %s2743_s16  ;;  %v1330_v7 = vrot.slane %v1328_v0, 1 }
  0xfc   : > { %v1460_v14 = vpop.permute.xlu0 %1459 }
  0xfd   : > { %v1462_v12 = vpop.permute.xlu1 %1461  ;;  %v1726_v27 = vsel %vm1716_vm1, %v1693_v23, %v1460_v14  ;;  %v1365_v14 = vrot.slane %v2669_v59, 1 }
  0xfe   : > { %1356 = vrot.lane.b32.xlu0 %v1142_v44, %s2747_s10  ;;  %v1728_v37 = vsel %vm1716_vm1, %v1695_v35, %v1462_v12  ;;  %v1442_v12 = vshll.u32 %v2670_v8, 16 }
  0xff   : > { %1358 = vrot.lane.b32.xlu1 %v1154_v15, %s2747_s10 }
 0x100   : > { %v1495_v46 = vpop.permute.xlu0 %1494  ;;  %v1444_v3 = vrot.slane %v1442_v12, 1 }
 0x101   : > { %v1180_v32 = vpop.permute.xlu1 %1179  ;;  %v1759_v34 = vsel %vm1749_vm3, %v1726_v27, %v1495_v46 }
 0x102   : > { %1391 = vrot.lane.b32.xlu0 %v1241_v56, %s2745_s20  ;;  %2533 = vmatprep.mubr.msk.bf16.mxu0 %vm1809_vm4, %v1759_v34  ;;  %v3427_v56 = vld [vmem:[#allocation2 + $0xc0] sm:$0xff]   ;;  %v1532_v11 = vsel %vm1518_vm11, %v3141_v36, %v1180_v32  ;;  %v1445_v2 = vor.u32 %v1444_v3, %v1440_v25 }
 0x103   : > { %1393 = vrot.lane.b32.xlu1 %v1244_v22, %s2745_s20  ;;  %v1323_v29 = vshll.u32 %v3427_v56, 16  ;;  %v1321_v63 = vshrl.u32 %v3427_v56, 16  ;;  %v1364_v28 = vrot.slane %v3427_v56, 1 }
 0x104   : > { %v1497_v38 = vpop.permute.xlu0 %1496 }
 0x105   : > { %v1182_v40 = vpop.permute.xlu1 %1181  ;;  %v1761_v42 = vsel %vm1749_vm3, %v1728_v37, %v1497_v38  ;;  %v1325_v26 = vrot.slane %v1323_v29, 1  ;;  %v1366_v16 = vsel %vm1199_vm6, %v1364_v28, %v1365_v14 }
 0x106   : > { %1428 = vrot.lane.b32.xlu0 %v3374_v53, %s2744_s17  ;;  %2534 = vmatmul.mubr.msk.bf16.gmra.mrb[8].mxu0 %vm1809_vm4, %v1761_v42  ;;  %v1534_v48 = vsel %vm1518_vm11, %v3186_v24, %v1182_v40  ;;  %v1447_v24 = vshll.u32 %v2671_v19, 16 }
 0x107   : > { %1430 = vrot.lane.b32.xlu1 %v3385_v6, %s2744_s17  ;;  %v1326_v49 = vor.u32 %v1325_v26, %v1321_v63 }
 0x108   : > { %v1261_v44 = vpop.permute.xlu0 %1260  ;;  %v1449_v39 = vrot.slane %v1447_v24, 1 }
 0x109   : > { %v1263_v47 = vpop.permute.xlu1 %1262  ;;  %v1565_v13 = vsel %vm1551_vm12, %v1532_v11, %v1261_v44  ;;  %v1331_v18 = vsel %vm974_vm2, %v1326_v49, %v1330_v7 }
 0x10a   : > { %1475 = vrot.lane.b32.xlu0 %v1154_v15, %s2748_s11  ;;  %v1567_v23 = vsel %vm1551_vm12, %v1534_v48, %v1263_v47  ;;  %v1483_v47 = vrot.slane %v2670_v8, 1 }
 0x10b   : > { %1477 = vrot.lane.b32.xlu1 %v1166_v45, %s2748_s11 }
 0x10c   : > { %v1298_v55 = vpop.permute.xlu0 %1297 }
 0x10d   : > { %v1300_v57 = vpop.permute.xlu1 %1299 }
 0x10e   : > { %1510 = vrot.lane.b32.xlu0 %v1244_v22, %s2746_s29  ;;  %v1600_v27 = vsel %vm1584_vm13, %v1567_v23, %v1300_v57  ;;  %v1485_v57 = vsel %vm1199_vm6, %v1483_v47, %v1484_v43 }
 0x10f   : > { %1195 = vrot.lane.b32.xlu1 %v1154_v15, %s2742_s15  ;;  %v1598_v15 = vsel %vm1584_vm13, %v1565_v13, %v1298_v55 }
 0x110   : > { %v1345_v58 = vpop.permute.xlu0 %1344 }
 0x111   : > { %v1347_v61 = vpop.permute.xlu1 %1346  ;;  %v1631_v36 = vsel %vm1617_vm14, %v1598_v15, %v1345_v58 }
 0x112   : > { %1512 = vrot.lane.b32.xlu0 %v1247_v41, %s2746_s29  ;;  %v1633_v31 = vsel %vm1617_vm14, %v1600_v27, %v1347_v61 }
 0x113   : > { %1197 = vrot.lane.b32.xlu1 %v1166_v45, %s2742_s15  ;;  %s2490_s15 = sshll.u32 %s2809_s25, 4  ;;  %s2752_s25 = smov [#allocation4]  }
 0x114   : > { %v1380_v62 = vpop.permute.xlu0 %1379  ;;  %s3694_s26 = scalar_lea.hbm %s3742_s6, %s2490_s15 }
 0x115   : > { %v1382_v4 = vpop.permute.xlu1 %1381  ;;  %v1664_v21 = vsel %vm1650_vm15, %v1631_v36, %v1380_v62 }
 0x116   : > { %1276 = vrot.lane.b32.xlu0 %v1244_v22, %s2741_s14  ;;  %v1666_v54 = vsel %vm1650_vm15, %v1633_v31, %v1382_v4 }
 0x117   : > { %1278 = vrot.lane.b32.xlu1 %v1247_v41, %s2741_s14 }
 0x118   : > { %v1417_v60 = vpop.permute.xlu0 %1416 }
 0x119   : > { %v1419_v10 = vpop.permute.xlu1 %1418  ;;  %v1697_v22 = vsel %vm1683_vm0, %v1664_v21, %v1417_v60 }
 0x11a   : > { %1313 = vrot.lane.b32.xlu0 %v3385_v6, %s2743_s16  ;;  %v1699_v35 = vsel %vm1683_vm0, %v1666_v54, %v1419_v10 }
 0x11b   : > { %1315 = vrot.lane.b32.xlu1 %v3427_v56, %s2743_s16 }
 0x11c   : > { %v1464_v17 = vpop.permute.xlu0 %1463 }
 0x11d   : > { %v1466_v20 = vpop.permute.xlu1 %1465  ;;  %v1730_v46 = vsel %vm1716_vm1, %v1697_v22, %v1464_v17 }
 0x11e   : > { %1360 = vrot.lane.b32.xlu0 %v1166_v45, %s2747_s10  ;;  %v1732_v37 = vsel %vm1716_vm1, %v1699_v35, %v1466_v20  ;;  %v1450_v45 = vsel %vm974_vm2, %v1445_v2, %v1449_v39  ;;  %vm2750_vm2 = vmmov 0  }
 0x11f   : > { %1362 = vrot.lane.b32.xlu1 %v1331_v18, %s2747_s10  ;;  %s2494_s10 = sshll.u32 %s2892_s9, 6  ;;  %s250_s9 = sand.u32 1, %s2730_s22  }
 0x120   : > { %v1499_v33 = vpop.permute.xlu0 %1498  ;;  %s3646_s18 = scalar_lea.vmem %s3741_s5, %s2494_s10  ;;  %s251_s16 = scalar_lea.vmem [#allocation4], %s250_s9 }
 0x121   : > { %v1184_v32 = vpop.permute.xlu1 %1183  ;;  %v1763_v34 = vsel %vm1749_vm3, %v1730_v46, %v1499_v33  ;;  %s2330_s28 = scalar_lea.sflag [#allocation5], %s250_s9  ;;  %s2680_s10 = sshll.u32 %s2752_s25, 4  ;;  %s2681_s10 = int_to_ptr.vmem [resolvable:$false] %s2680_s10 }
 0x122   : > { %1395 = vrot.lane.b32.xlu0 %v1247_v41, %s2745_s20  ;;  %2537 = vmatprep.mubr.msk.bf16.mxu0 %vm1809_vm4, %v1763_v34  ;;  %v1536_v63 = vsel %vm1518_vm11, %v3228_v9, %v1184_v32 }
 0x123   : > { %1397 = vrot.lane.b32.xlu1 %v1366_v16, %s2745_s20 }
 0x124   : > { %v1501_v38 = vpop.permute.xlu0 %1500 }
 0x125   : > { %v1186_v40 = vpop.permute.xlu1 %1185  ;;  %v1765_v42 = vsel %vm1749_vm3, %v1732_v37, %v1501_v38 }
 0x126   : > { %1432 = vrot.lane.b32.xlu0 %v3427_v56, %s2744_s17  ;;  %2538 = vmatmul.mubr.msk.bf16.gmra.mrb[12].mxu0 %vm1809_vm4, %v1765_v42  ;;  %v1538_v7 = vsel %vm1518_vm11, %v3246_v30, %v1186_v40 }
 0x127   : > { %1434 = vrot.lane.b32.xlu1 %v2670_v8, %s2744_s17  ;;  %s2345_s17 = sshll.u32 %s251_s16, 4  ;;  %s3696_s17 = int_to_ptr.vmem [resolvable:$true] %s2345_s17 }
 0x128   : > { %v1265_v44 = vpop.permute.xlu0 %1264  ;;  %p2683_p0 = scmp.lt.s32.totalorder %s3696_s17, %s2681_s10 }
 0x129   : > { %v1267_v51 = vpop.permute.xlu1 %1266  ;;  %v1569_v26 = vsel %vm1551_vm12, %v1536_v63, %v1265_v44 }
 0x12a   : > { %1479 = vrot.lane.b32.xlu0 %v1331_v18, %s2748_s11  ;;  %v1571_v10 = vsel %vm1551_vm12, %v1538_v7, %v1267_v51 }
 0x12b   : > { %1481 = vrot.lane.b32.xlu1 %v1450_v45, %s2748_s11  ;;  %s2682_s11 = scalar_lea.vmem %s2681_s10, 32 }
 0x12c   : > { %v1302_v55 = vpop.permute.xlu0 %1301 }
 0x12d   : > { %v1304_v41 = vpop.permute.xlu1 %1303  ;;  %v1602_v0 = vsel %vm1584_vm13, %v1569_v26, %v1302_v55 }
 0x12e   : > { %1514 = vrot.lane.b32.xlu0 %v1366_v16, %s2746_s29  ;;  %v1604_v13 = vsel %vm1584_vm13, %v1571_v10, %v1304_v41 }
 0x12f   : > { %1516 = vrot.lane.b32.xlu1 %v1485_v57, %s2746_s29  ;;  %s2676_s29 = scalar_lea.vmem %s3696_s17, 16 }
 0x130   : > { %v1349_v56 = vpop.permute.xlu0 %1348  ;;  %p2677_p11 = scmp.ne.s32.totalorder %s3696_s17, %s2676_s29  ;;  %p2684_p1 = scmp.lt.s32.totalorder %s2682_s11, %s2676_s29 }
 0x131   : > { %v1351_v58 = vpop.permute.xlu1 %1350  ;;  %v1635_v60 = vsel %vm1617_vm14, %v1602_v0, %v1349_v56 }
 0x132   : > { %v1637_v14 = vsel %vm1617_vm14, %v1604_v13, %v1351_v58  ;;  %p2678_p12 = pnand %p2677_p11, %p2826_p5  ;;  %p2685_p2 = por %p2684_p1, %p2683_p0 }
 0x134   : > { %v1384_v59 = vpop.permute.xlu0 %1383  ;;  %p2679_p13 = pneg %p2678_p12 }
 0x135   : > { %v1386_v29 = vpop.permute.xlu1 %1385  ;;  %v1668_v8 = vsel %vm1650_vm15, %v1635_v60, %v1384_v59 }
 0x136   : > { %v1670_v18 = vsel %vm1650_vm15, %v1637_v14, %v1386_v29  ;;  %p2686_p3 = pnand %p2685_p2, %p2679_p13 }
 0x138   : > { %v1421_v61 = vpop.permute.xlu0 %1420 }
 0x139   : > { %v1423_v62 = vpop.permute.xlu1 %1422  ;;  %v1701_v11 = vsel %vm1683_vm0, %v1668_v8, %v1421_v61 }
 0x13a   : > { %v1703_v30 = vsel %vm1683_vm0, %v1670_v18, %v1423_v62 }
 0x13c   : > { %v1468_v4 = vpop.permute.xlu0 %1467 }
 0x13d   : > { %v1470_v49 = vpop.permute.xlu1 %1469  ;;  %v1734_v9 = vsel %vm1716_vm1, %v1701_v11, %v1468_v4 }
 0x13e   : > { %v1736_v19 = vsel %vm1716_vm1, %v1703_v30, %v1470_v49 }
 0x140   : > { %v1503_v28 = vpop.permute.xlu0 %1502 }
 0x141   : > { %v1188_v15 = vpop.permute.xlu1 %1187  ;;  %v1767_v17 = vsel %vm1749_vm3, %v1734_v9, %v1503_v28 }
 0x142   : > { %2541 = vmatprep.mubr.msk.bf16.mxu0 %vm1809_vm4, %v1767_v17  ;;  %v1540_v24 = vsel %vm1518_vm11, %v3269_v52, %v1188_v15 }
 0x144   : > { %v1505_v12 = vpop.permute.xlu0 %1504 }
 0x145   : > { %v1190_v36 = vpop.permute.xlu1 %1189  ;;  %v1769_v20 = vsel %vm1749_vm3, %v1736_v19, %v1505_v12 }
 0x146   : > { %2542 = vmatmul.mubr.msk.bf16.gmra.mrb[16].mxu0 %vm1809_vm4, %v1769_v20  ;;  %v1542_v37 = vsel %vm1518_vm11, %v3281_v5, %v1190_v36 }
 0x148   : > { %v1269_v48 = vpop.permute.xlu0 %1268 }
 0x149   : > { %v1271_v21 = vpop.permute.xlu1 %1270  ;;  %v1573_v31 = vsel %vm1551_vm12, %v1540_v24, %v1269_v48  ;;  %v3541_v24 = vld [vmem:[%s3738_s2] ss:$0 sm:$0xff] }
 0x14a   : > { %v1575_v2 = vsel %vm1551_vm12, %v1542_v37, %v1271_v21 }
 0x14c   : > { %v1306_v23 = vpop.permute.xlu0 %1305 }
 0x14d   : > { %v1308_v22 = vpop.permute.xlu1 %1307  ;;  %v1606_v32 = vsel %vm1584_vm13, %v1573_v31, %v1306_v23 }
 0x14e   : > { %v1608_v40 = vsel %vm1584_vm13, %v1575_v2, %v1308_v22 }
 0x150   : > { %v1353_v16 = vpop.permute.xlu0 %1352 }
 0x151   : > { %v1355_v25 = vpop.permute.xlu1 %1354  ;;  %v1639_v54 = vsel %vm1617_vm14, %v1606_v32, %v1353_v16 }
 0x152   : > { %v1641_v44 = vsel %vm1617_vm14, %v1608_v40, %v1355_v25 }
 0x154   : > { %v1388_v27 = vpop.permute.xlu0 %1387 }
 0x155   : > { %v1390_v46 = vpop.permute.xlu1 %1389  ;;  %v1672_v38 = vsel %vm1650_vm15, %v1639_v54, %v1388_v27 }
 0x156   : > { %v1674_v43 = vsel %vm1650_vm15, %v1641_v44, %v1390_v46 }
 0x158   : > { %v1425_v33 = vpop.permute.xlu0 %1424 }
 0x159   : > { %v1427_v3 = vpop.permute.xlu1 %1426  ;;  %v1705_v39 = vsel %vm1683_vm0, %v1672_v38, %v1425_v33 }
 0x15a   : > { %v1707_v5 = vsel %vm1683_vm0, %v1674_v43, %v1427_v3 }
 0x15c   : > { %v1472_v34 = vpop.permute.xlu0 %1471 }
 0x15d   : > { %v1474_v35 = vpop.permute.xlu1 %1473  ;;  %v1738_v52 = vsel %vm1716_vm1, %v1705_v39, %v1472_v34 }
 0x15e   : > { %v1740_v51 = vsel %vm1716_vm1, %v1707_v5, %v1474_v35 }
 0x160   : > { %v1507_v42 = vpop.permute.xlu0 %1506 }
 0x161   : > { %v1192_v45 = vpop.permute.xlu1 %1191  ;;  %v1771_v47 = vsel %vm1749_vm3, %v1738_v52, %v1507_v42 }
 0x162   : > { %2545 = vmatprep.mubr.msk.bf16.mxu1 %vm1809_vm4, %v1771_v47  ;;  %v1544_v60 = vsel %vm1518_vm11, %v3322_v50, %v1192_v45 }
 0x164   : > { %v1509_v55 = vpop.permute.xlu0 %1508 }
 0x165   : > { %v1194_v57 = vpop.permute.xlu1 %1193  ;;  %v1773_v41 = vsel %vm1749_vm3, %v1740_v51, %v1509_v55 }
 0x166   : > { %2546 = vmatmul.mubr.msk.bf16.vlgmr.msra.gmra.mrb[0].mxu1 %vm1809_vm4, %v1773_v41  ;;  %v1546_v13 = vsel %vm1518_vm11, %v3333_v1, %v1194_v57 }
 0x168   : > { %v1273_v56 = vpop.permute.xlu0 %1272 }
 0x169   : > { %v1275_v58 = vpop.permute.xlu1 %1274  ;;  %v1577_v49 = vsel %vm1551_vm12, %v1544_v60, %v1273_v56 }
 0x16a   : > { %v1579_v28 = vsel %vm1551_vm12, %v1546_v13, %v1275_v58 }
 0x16c   : > { %v1310_v59 = vpop.permute.xlu0 %1309 }
 0x16d   : > { %v1312_v29 = vpop.permute.xlu1 %1311  ;;  %v1610_v7 = vsel %vm1584_vm13, %v1577_v49, %v1310_v59 }
 0x16e   : > { %v1612_v15 = vsel %vm1584_vm13, %v1579_v28, %v1312_v29 }
 0x170   : > { %v1357_v61 = vpop.permute.xlu0 %1356 }
 0x171   : > { %v1359_v62 = vpop.permute.xlu1 %1358  ;;  %v1643_v10 = vsel %vm1617_vm14, %v1610_v7, %v1357_v61 }
 0x172   : > { %v1645_v18 = vsel %vm1617_vm14, %v1612_v15, %v1359_v62 }
 0x174   : > { %v1392_v63 = vpop.permute.xlu0 %1391 }
 0x175   : > { %v1394_v26 = vpop.permute.xlu1 %1393  ;;  %v1676_v9 = vsel %vm1650_vm15, %v1643_v10, %v1392_v63 }
 0x176   : > { %v1678_v12 = vsel %vm1650_vm15, %v1645_v18, %v1394_v26 }
 0x178   : > { %v1429_v0 = vpop.permute.xlu0 %1428 }
 0x179   : > { %v1431_v4 = vpop.permute.xlu1 %1430  ;;  %v1709_v14 = vsel %vm1683_vm0, %v1676_v9, %v1429_v0 }
 0x17a   : > { %v1711_v1 = vsel %vm1683_vm0, %v1678_v12, %v1431_v4 }
 0x17c   : > { %v1476_v8 = vpop.permute.xlu0 %1475 }
 0x17d   : > { %v1478_v11 = vpop.permute.xlu1 %1477  ;;  %v1742_v50 = vsel %vm1716_vm1, %v1709_v14, %v1476_v8 }
 0x17e   : > { %v1744_v36 = vsel %vm1716_vm1, %v1711_v1, %v1478_v11 }
 0x180   : > { %v1511_v17 = vpop.permute.xlu0 %1510 }
 0x181   : > { %v1196_v30 = vpop.permute.xlu1 %1195  ;;  %v1775_v19 = vsel %vm1749_vm3, %v1742_v50, %v1511_v17 }
 0x182   : > { %2549 = vmatprep.mubr.msk.bf16.mxu1 %vm1809_vm4, %v1775_v19  ;;  %v1548_v54 = vsel %vm1518_vm11, %v3374_v53, %v1196_v30 }
 0x184   : > { %v1513_v20 = vpop.permute.xlu0 %1512 }
 0x185   : > { %v1198_v48 = vpop.permute.xlu1 %1197  ;;  %v1777_v21 = vsel %vm1749_vm3, %v1744_v36, %v1513_v20 }
 0x186   : > { %2550 = vmatmul.mubr.msk.bf16.gmra.mrb[4].mxu1 %vm1809_vm4, %v1777_v21  ;;  %v1550_v38 = vsel %vm1518_vm11, %v3385_v6, %v1198_v48 }
 0x188   : > { %v1277_v23 = vpop.permute.xlu0 %1276 }
 0x189   : > { %v1279_v22 = vpop.permute.xlu1 %1278  ;;  %v1581_v2 = vsel %vm1551_vm12, %v1548_v54, %v1277_v23 }
 0x18a   : > { %v1583_v52 = vsel %vm1551_vm12, %v1550_v38, %v1279_v22 }
 0x18c   : > { %v1314_v16 = vpop.permute.xlu0 %1313 }
 0x18d   : > { %v1316_v25 = vpop.permute.xlu1 %1315  ;;  %v1614_v42 = vsel %vm1584_vm13, %v1581_v2, %v1314_v16 }
 0x18e   : > { %v1616_v43 = vsel %vm1584_vm13, %v1583_v52, %v1316_v25 }
 0x190   : > { %v1361_v27 = vpop.permute.xlu0 %1360 }
 0x191   : > { %v1363_v46 = vpop.permute.xlu1 %1362  ;;  %v1647_v5 = vsel %vm1617_vm14, %v1614_v42, %v1361_v27 }
 0x192   : > { %v1649_v57 = vsel %vm1617_vm14, %v1616_v43, %v1363_v46 }
 0x194   : > { %v1396_v33 = vpop.permute.xlu0 %1395 }
 0x195   : > { %v1398_v3 = vpop.permute.xlu1 %1397  ;;  %v1680_v41 = vsel %vm1650_vm15, %v1647_v5, %v1396_v33 }
 0x196   : > { %v1682_v58 = vsel %vm1650_vm15, %v1649_v57, %v1398_v3 }
 0x198   : > { %v1433_v31 = vpop.permute.xlu0 %1432 }
 0x199   : > { %v1435_v32 = vpop.permute.xlu1 %1434  ;;  %v2527_v34 = vpop.f32.mrb[0].mxu0  ;;  %v1713_v59 = vsel %vm1683_vm0, %v1680_v41, %v1433_v31 }
 0x19a   : > { %v1889_v35 = vadd.f32 %v2527_v34, %v3541_v24  ;;  %v1880_v37 = vpop.f32.mrb[1].mxu0  ;;  %v1715_v61 = vsel %vm1683_vm0, %v1682_v58, %v1435_v32 }
 0x19b   : > { %v1881_v39 = vadd.f32 %v3541_v24, %v1880_v37  ;;  %v2528_v40 = vpop.f32.mrb[2].mxu0 }
 0x19c   : > { %v2009_v44 = vmax.f32 %v1889_v35, 0.0  ;;  %v1892_v45 = vadd.f32 %v2528_v40, %v3541_v24  ;;  %v1883_v47 = vpop.f32.mrb[3].mxu0  ;;  %v1480_v53 = vpop.permute.xlu0 %1479 }
 0x19d   : > { %v2007_v51 = vmax.f32 %v1881_v39, 0.0  ;;  %v1482_v6 = vpop.permute.xlu1 %1481  ;;  %v1884_v55 = vadd.f32 %v3541_v24, %v1883_v47  ;;  %v1746_v62 = vsel %vm1716_vm1, %v1713_v59, %v1480_v53 }
 0x19e   : > { %2041 = vst.msk [vmem:[#allocation3 + $0x10] sm:$0xff] %vm1749_vm3, %v2009_v44  ;;  %v2010_v56 = vmax.f32 %v1892_v45, 0.0  ;;  %v1748_v26 = vsel %vm1716_vm1, %v1715_v61, %v1482_v6 }
 0x19f   : > { %2039 = vst.msk [vmem:[#allocation3] sm:$0xff] %vm1749_vm3, %v2007_v51  ;;  %v2008_v29 = vmax.f32 %v1884_v55, 0.0 }
 0x1a0   : > { %2042 = vst.msk [vmem:[#allocation3 + $0x18] sm:$0xff] %vm1749_vm3, %v2010_v56  ;;  %v1515_v63 = vpop.permute.xlu0 %1514 }
 0x1a1   : > { %2040 = vst.msk [vmem:[#allocation3 + $0x8] sm:$0xff] %vm1749_vm3, %v2008_v29  ;;  %v1517_v0 = vpop.permute.xlu1 %1516  ;;  %v1779_v4 = vsel %vm1749_vm3, %v1746_v62, %v1515_v63 }
 0x1a2   : > { %v1781_v60 = vsel %vm1749_vm3, %v1748_v26, %v1517_v0  ;;  %2553 = vmatprep.mubr.msk.bf16.mxu1 %vm1809_vm4, %v1779_v4 }
 0x1a3   : > { %2554 = vmatmul.mubr.msk.bf16.gmra.mrb[8].mxu1 %vm1809_vm4, %v1781_v60 }
 0x1a5   : > { %v2073_v8 = vld [vmem:[#allocation3 + $0x10] sm:$0xff] }
 0x1a6   : > { %v2071_v49 = vld [vmem:[#allocation3] sm:$0xff]  ;;  %v2178_v28 = vsel %vm1749_vm3, %v2073_v8, 0.0 }
 0x1a7   : > { %2103 = vxpose.xlu0.b32.start [1/16] (narrow) %v2071_v49, 32  ;;  %v2175_v10 = vsel %vm1749_vm3, %v2071_v49, 0.0  ;;  %v2074_v9 = vld [vmem:[#allocation3 + $0x18] sm:$0xff] }
 0x1a8   : > { %v2072_v7 = vld [vmem:[#allocation3 + $0x8] sm:$0xff]  ;;  %v2180_v15 = vsel %vm1749_vm3, %v2074_v9, 0.0 }
 0x1a9   : > { %v2176_v11 = vsel %vm1749_vm3, %v2072_v7, 0.0 }
 0x1aa   : > { %v2177_v13 = vadd.f32 %v2176_v11, %v2175_v10 }
 0x1ab   : > { %2104 = vxpose.xlu0.b32.cont [2/16] (narrow) %v2072_v7, 32 }
 0x1ac   : > { %v2179_v14 = vadd.f32 %v2178_v28, %v2177_v13  ;;  %v2244_v28 = vld [vmem:[%s3739_s3] sm:$0xff] }
 0x1ae   : > { %v2181_v50 = vadd.f32 %v2180_v15, %v2179_v14  ;;  %v2245_v14 = vld [vmem:[%s3739_s3 + $0x8] sm:$0xff] }
 0x1af   : > { %2105 = vxpose.xlu0.b32.cont [3/16] (narrow) %v2073_v8, 32 }
 0x1b3   : > { %2106 = vxpose.xlu0.b32.cont [4/16] (narrow) %v2074_v9, 32 }
 0x1b9   : > { %v2531_v17 = vpop.f32.mrb[4].mxu0 }
 0x1ba   : > { %v1905_v18 = vadd.f32 %v2531_v17, %v3541_v24  ;;  %v1896_v30 = vpop.f32.mrb[5].mxu0  ;;  %v2569_v17 = vpack.c.bf16 %v2245_v14, %v2244_v28 }
 0x1bb   : > { %v1897_v19 = vadd.f32 %v3541_v24, %v1896_v30  ;;  %v2532_v12 = vpop.f32.mrb[6].mxu0 }
 0x1bc   : > { %v2013_v1 = vmax.f32 %v1905_v18, 0.0  ;;  %v1908_v36 = vadd.f32 %v2532_v12, %v3541_v24  ;;  %v1899_v20 = vpop.f32.mrb[7].mxu0 }
 0x1bd   : > { %v2011_v48 = vmax.f32 %v1897_v19, 0.0  ;;  %v1900_v21 = vadd.f32 %v3541_v24, %v1899_v20 }
 0x1be   : > { %2045 = vst.msk [vmem:[#allocation3 + $0x30] sm:$0xff] %vm1749_vm3, %v2013_v1  ;;  %v2014_v23 = vmax.f32 %v1908_v36, 0.0 }
 0x1bf   : > { %2043 = vst.msk [vmem:[#allocation3 + $0x20] sm:$0xff] %vm1749_vm3, %v2011_v48  ;;  %v2012_v22 = vmax.f32 %v1900_v21, 0.0 }
 0x1c0   : > { %2046 = vst.msk [vmem:[#allocation3 + $0x38] sm:$0xff] %vm1749_vm3, %v2014_v23 }
 0x1c1   : > { %2044 = vst.msk [vmem:[#allocation3 + $0x28] sm:$0xff] %vm1749_vm3, %v2012_v22  ;;  %v2246_v22 = vld [vmem:[%s3739_s3 + $0x10] sm:$0xff] }
 0x1c5   : > { %v2077_v33 = vld [vmem:[#allocation3 + $0x30] sm:$0xff] }
 0x1c6   : > { %v2075_v16 = vld [vmem:[#allocation3 + $0x20] sm:$0xff]  ;;  %v2186_v34 = vsel %vm1749_vm3, %v2077_v33, 0.0 }
 0x1c7   : > { %v2182_v25 = vsel %vm1749_vm3, %v2075_v16, 0.0  ;;  %2107 = vxpose.xlu0.b32.cont [5/16] (narrow) %v2075_v16, 32  ;;  %v2078_v32 = vld [vmem:[#allocation3 + $0x38] sm:$0xff]  ;;  %v2247_v16 = vld [vmem:[%s3739_s3 + $0x18] sm:$0xff] }
 0x1c8   : > { %v2183_v27 = vadd.f32 %v2182_v25, %v2181_v50  ;;  %v2076_v46 = vld [vmem:[#allocation3 + $0x28] sm:$0xff]  ;;  %v2188_v35 = vsel %vm1749_vm3, %v2078_v32, 0.0  ;;  %v2749_v50 = vmov 0.0|0.0  }
 0x1c9   : > { %v2184_v3 = vsel %vm1749_vm3, %v2076_v46, 0.0  ;;  %2568 = vmatprep.subr.bf16.mxu1 %v2749_v50 }
 0x1ca   : > { %v2185_v31 = vadd.f32 %v2184_v3, %v2183_v27  ;;  %2570 = vmatpush3.bf16.msra.mxu1 %v2569_v17  ;;  %v2572_v27 = vpack.c.bf16 %v2247_v16, %v2246_v22 }
 0x1cb   : > { %2108 = vxpose.xlu0.b32.cont [6/16] (narrow) %v2076_v46, 32  ;;  %2571 = vmatprep.subr.bf16.mxu1 %v2749_v50 }
 0x1cc   : > { %v2187_v54 = vadd.f32 %v2186_v34, %v2185_v31 }
 0x1ce   : > { %v2189_v37 = vadd.f32 %v2188_v35, %v2187_v54  ;;  %2573 = vmatpush3.bf16.msra.mxu1 %v2572_v27 }
 0x1cf   : > { %2109 = vxpose.xlu0.b32.cont [7/16] (narrow) %v2077_v33, 32  ;;  %v2751_v33 = vmov 0.0  }
 0x1d0   : > { %2565 = vmatprep.mubr.msk.f32.mxu1 %vm2750_vm2, %v2751_v33 }
 0x1d3   : > { %2110 = vxpose.xlu0.b32.cont [8/16] (narrow) %v2078_v32, 32 }
 0x1d9   : > { %v2535_v38 = vpop.f32.mrb[8].mxu0 }
 0x1da   : > { %v1921_v2 = vadd.f32 %v2535_v38, %v3541_v24  ;;  %v1912_v39 = vpop.f32.mrb[9].mxu0 }
 0x1db   : > { %v1913_v40 = vadd.f32 %v3541_v24, %v1912_v39  ;;  %v2536_v52 = vpop.f32.mrb[10].mxu0 }
 0x1dc   : > { %v2017_v42 = vmax.f32 %v1921_v2, 0.0  ;;  %v1924_v44 = vadd.f32 %v2536_v52, %v3541_v24  ;;  %v1915_v45 = vpop.f32.mrb[11].mxu0 }
 0x1dd   : > { %v2015_v47 = vmax.f32 %v1913_v40, 0.0  ;;  %v1916_v53 = vadd.f32 %v3541_v24, %v1915_v45 }
 0x1de   : > { %2049 = vst.msk [vmem:[#allocation3 + $0x50] sm:$0xff] %vm1749_vm3, %v2017_v42  ;;  %v2018_v43 = vmax.f32 %v1924_v44, 0.0 }
 0x1df   : > { %2047 = vst.msk [vmem:[#allocation3 + $0x40] sm:$0xff] %vm1749_vm3, %v2015_v47  ;;  %v2016_v5 = vmax.f32 %v1916_v53, 0.0 }
 0x1e0   : > { %2050 = vst.msk [vmem:[#allocation3 + $0x58] sm:$0xff] %vm1749_vm3, %v2018_v43 }
 0x1e1   : > { %2048 = vst.msk [vmem:[#allocation3 + $0x48] sm:$0xff] %vm1749_vm3, %v2016_v5 }
 0x1e5   : > { %v2081_v41 = vld [vmem:[#allocation3 + $0x50] sm:$0xff] }
 0x1e6   : > { %v2079_v51 = vld [vmem:[#allocation3 + $0x40] sm:$0xff]  ;;  %v2194_v29 = vsel %vm1749_vm3, %v2081_v41, 0.0 }
 0x1e7   : > { %2111 = vxpose.xlu0.b32.cont [9/16] (narrow) %v2079_v51, 32  ;;  %v2190_v6 = vsel %vm1749_vm3, %v2079_v51, 0.0  ;;  %v2082_v59 = vld [vmem:[#allocation3 + $0x58] sm:$0xff] }
 0x1e8   : > { %v2191_v55 = vadd.f32 %v2190_v6, %v2189_v37  ;;  %v2080_v57 = vld [vmem:[#allocation3 + $0x48] sm:$0xff]  ;;  %v2196_v62 = vsel %vm1749_vm3, %v2082_v59, 0.0 }
 0x1e9   : > { %v2192_v56 = vsel %vm1749_vm3, %v2080_v57, 0.0 }
 0x1ea   : > { %v2193_v58 = vadd.f32 %v2192_v56, %v2191_v55 }
 0x1eb   : > { %2112 = vxpose.xlu0.b32.cont [10/16] (narrow) %v2080_v57, 32 }
 0x1ec   : > { %v2195_v61 = vadd.f32 %v2194_v29, %v2193_v58 }
 0x1ee   : > { %v2197_v63 = vadd.f32 %v2196_v62, %v2195_v61 }
 0x1ef   : > { %2113 = vxpose.xlu0.b32.cont [11/16] (narrow) %v2081_v41, 32 }
 0x1f3   : > { %2114 = vxpose.xlu0.b32.cont [12/16] (narrow) %v2082_v59, 32 }
 0x1f9   : > { %v2539_v26 = vpop.f32.mrb[12].mxu0 }
 0x1fa   : > { %v1937_v0 = vadd.f32 %v2539_v26, %v3541_v24  ;;  %v1928_v4 = vpop.f32.mrb[13].mxu0 }
 0x1fb   : > { %v1929_v60 = vadd.f32 %v3541_v24, %v1928_v4  ;;  %v2540_v49 = vpop.f32.mrb[14].mxu0 }
 0x1fc   : > { %v2021_v7 = vmax.f32 %v1937_v0, 0.0  ;;  %v1940_v8 = vadd.f32 %v2540_v49, %v3541_v24  ;;  %v1931_v10 = vpop.f32.mrb[15].mxu0 }
 0x1fd   : > { %v2019_v11 = vmax.f32 %v1929_v60, 0.0  ;;  %v1932_v13 = vadd.f32 %v3541_v24, %v1931_v10 }
 0x1fe   : > { %2053 = vst.msk [vmem:[#allocation3 + $0x70] sm:$0xff] %vm1749_vm3, %v2021_v7  ;;  %v2022_v9 = vmax.f32 %v1940_v8, 0.0 }
 0x1ff   : > { %2051 = vst.msk [vmem:[#allocation3 + $0x60] sm:$0xff] %vm1749_vm3, %v2019_v11  ;;  %v2020_v15 = vmax.f32 %v1932_v13, 0.0 }
 0x200   : > { %2054 = vst.msk [vmem:[#allocation3 + $0x78] sm:$0xff] %vm1749_vm3, %v2022_v9 }
 0x201   : > { %2052 = vst.msk [vmem:[#allocation3 + $0x68] sm:$0xff] %vm1749_vm3, %v2020_v15 }
 0x205   : > { %v2085_v1 = vld [vmem:[#allocation3 + $0x70] sm:$0xff] }
 0x206   : > { %v2083_v18 = vld [vmem:[#allocation3 + $0x60] sm:$0xff]  ;;  %v2202_v21 = vsel %vm1749_vm3, %v2085_v1, 0.0 }
 0x207   : > { %2115 = vxpose.xlu0.b32.cont [13/16] (narrow) %v2083_v18, 32  ;;  %v2198_v30 = vsel %vm1749_vm3, %v2083_v18, 0.0  ;;  %v2086_v48 = vld [vmem:[#allocation3 + $0x78] sm:$0xff] }
 0x208   : > { %v2199_v19 = vadd.f32 %v2198_v30, %v2197_v63  ;;  %v2084_v12 = vld [vmem:[#allocation3 + $0x68] sm:$0xff]  ;;  %v2204_v25 = vsel %vm1749_vm3, %v2086_v48, 0.0 }
 0x209   : > { %v2200_v36 = vsel %vm1749_vm3, %v2084_v12, 0.0 }
 0x20a   : > { %v2201_v20 = vadd.f32 %v2200_v36, %v2199_v19 }
 0x20b   : > { %2116 = vxpose.xlu0.b32.cont [14/16] (narrow) %v2084_v12, 32 }
 0x20c   : > { %v2203_v23 = vadd.f32 %v2202_v21, %v2201_v20 }
 0x20e   : > { %v2205_v46 = vadd.f32 %v2204_v25, %v2203_v23 }
 0x20f   : > { %2117 = vxpose.xlu0.b32.cont [15/16] (narrow) %v2085_v1, 32 }
 0x213   : > { %2118 = vxpose.xlu0.b32.end [16/16] (narrow) %v2086_v48, 32 }
 0x219   : > { %v2543_v3 = vpop.f32.mrb[16].mxu0 }
 0x21a   : > { %v1953_v31 = vadd.f32 %v2543_v3, %v3541_v24  ;;  %v1944_v32 = vpop.f32.mrb[17].mxu0 }
 0x21b   : > { %v1945_v34 = vadd.f32 %v3541_v24, %v1944_v32  ;;  %v2544_v54 = vpop.f32.mrb[18].mxu0 }
 0x21c   : > { %v2025_v35 = vmax.f32 %v1953_v31, 0.0  ;;  %v1956_v37 = vadd.f32 %v2544_v54, %v3541_v24  ;;  %v1947_v38 = vpop.f32.mrb[19].mxu0 }
 0x21d   : > { %v2023_v2 = vmax.f32 %v1945_v34, 0.0  ;;  %v1948_v39 = vadd.f32 %v3541_v24, %v1947_v38 }
 0x21e   : > { %2057 = vst.msk [vmem:[#allocation3 + $0x90] sm:$0xff] %vm1749_vm3, %v2025_v35  ;;  %v2026_v40 = vmax.f32 %v1956_v37, 0.0 }
 0x21f   : > { %2055 = vst.msk [vmem:[#allocation3 + $0x80] sm:$0xff] %vm1749_vm3, %v2023_v2  ;;  %v2024_v52 = vmax.f32 %v1948_v39, 0.0 }
 0x220   : > { %2058 = vst.msk [vmem:[#allocation3 + $0x98] sm:$0xff] %vm1749_vm3, %v2026_v40 }
 0x221   : > { %2056 = vst.msk [vmem:[#allocation3 + $0x88] sm:$0xff] %vm1749_vm3, %v2024_v52 }
 0x225   : > { %v2089_v53 = vld [vmem:[#allocation3 + $0x90] sm:$0xff] }
 0x226   : > { %v2087_v42 = vld [vmem:[#allocation3 + $0x80] sm:$0xff]  ;;  %v2210_v51 = vsel %vm1749_vm3, %v2089_v53, 0.0 }
 0x227   : > { %2135 = vxpose.xlu1.b32.start [1/16] (narrow) %v2087_v42, 32  ;;  %v2206_v44 = vsel %vm1749_vm3, %v2087_v42, 0.0  ;;  %v2090_v55 = vld [vmem:[#allocation3 + $0x98] sm:$0xff] }
 0x228   : > { %v2207_v45 = vadd.f32 %v2206_v44, %v2205_v46  ;;  %v2088_v47 = vld [vmem:[#allocation3 + $0x88] sm:$0xff]  ;;  %v2212_v20 = vsel %vm1749_vm3, %v2090_v55, 0.0 }
 0x229   : > { %v2208_v43 = vsel %vm1749_vm3, %v2088_v47, 0.0 }
 0x22a   : > { %v2209_v5 = vadd.f32 %v2208_v43, %v2207_v45 }
 0x22b   : > { %2136 = vxpose.xlu1.b32.cont [2/16] (narrow) %v2088_v47, 32 }
 0x22c   : > { %v2211_v6 = vadd.f32 %v2210_v51, %v2209_v5 }
 0x22e   : > { %v2213_v23 = vadd.f32 %v2212_v20, %v2211_v6 }
 0x22f   : > { %2137 = vxpose.xlu1.b32.cont [3/16] (narrow) %v2089_v53, 32 }
 0x233   : > { %2138 = vxpose.xlu1.b32.cont [4/16] (narrow) %v2090_v55, 32 }
 0x239   : > { %v2547_v57 = vpop.f32.mrb[0].mxu1 }
 0x23a   : > { %v1969_v41 = vadd.f32 %v2547_v57, %v3541_v24  ;;  %v1960_v56 = vpop.f32.mrb[1].mxu1 }
 0x23b   : > { %v1961_v58 = vadd.f32 %v3541_v24, %v1960_v56  ;;  %v2548_v59 = vpop.f32.mrb[2].mxu1 }
 0x23c   : > { %v2029_v29 = vmax.f32 %v1969_v41, 0.0  ;;  %v1972_v61 = vadd.f32 %v2548_v59, %v3541_v24  ;;  %v1963_v62 = vpop.f32.mrb[3].mxu1 }
 0x23d   : > { %v2027_v63 = vmax.f32 %v1961_v58, 0.0  ;;  %v1964_v26 = vadd.f32 %v3541_v24, %v1963_v62 }
 0x23e   : > { %2061 = vst.msk [vmem:[#allocation3 + $0xb0] sm:$0xff] %vm1749_vm3, %v2029_v29  ;;  %v2030_v0 = vmax.f32 %v1972_v61, 0.0 }
 0x23f   : > { %2059 = vst.msk [vmem:[#allocation3 + $0xa0] sm:$0xff] %vm1749_vm3, %v2027_v63  ;;  %v2028_v4 = vmax.f32 %v1964_v26, 0.0 }
 0x240   : > { %2062 = vst.msk [vmem:[#allocation3 + $0xb8] sm:$0xff] %vm1749_vm3, %v2030_v0 }
 0x241   : > { %2060 = vst.msk [vmem:[#allocation3 + $0xa8] sm:$0xff] %vm1749_vm3, %v2028_v4 }
 0x245   : > { %v2093_v7 = vld [vmem:[#allocation3 + $0xb0] sm:$0xff] }
 0x246   : > { %v2091_v60 = vld [vmem:[#allocation3 + $0xa0] sm:$0xff]  ;;  %v2218_v33 = vsel %vm1749_vm3, %v2093_v7, 0.0 }
 0x247   : > { %2139 = vxpose.xlu1.b32.cont [5/16] (narrow) %v2091_v60, 32  ;;  %v2094_v8 = vld [vmem:[#allocation3 + $0xb8] sm:$0xff]  ;;  %v2214_v48 = vsel %vm1749_vm3, %v2091_v60, 0.0 }
 0x248   : > { %v2092_v49 = vld [vmem:[#allocation3 + $0xa8] sm:$0xff]  ;;  %v2215_v22 = vadd.f32 %v2214_v48, %v2213_v23  ;;  %v2220_v32 = vsel %vm1749_vm3, %v2094_v8, 0.0 }
 0x249   : > { %v2216_v16 = vsel %vm1749_vm3, %v2092_v49, 0.0 }
 0x24a   : > { %v2217_v27 = vadd.f32 %v2216_v16, %v2215_v22 }
 0x24b   : > { %2140 = vxpose.xlu1.b32.cont [6/16] (narrow) %v2092_v49, 32 }
 0x24c   : > { %v2219_v3 = vadd.f32 %v2218_v33, %v2217_v27 }
 0x24e   : > { %v2221_v54 = vadd.f32 %v2220_v32, %v2219_v3 }
 0x24f   : > { %2141 = vxpose.xlu1.b32.cont [7/16] (narrow) %v2093_v7, 32 }
 0x253   : > { %2142 = vxpose.xlu1.b32.cont [8/16] (narrow) %v2094_v8, 32 }
 0x257   : > { %v2119_v10 = vpop.trf.xlu0 }
 0x258   : > { %2167 = vst [vmem:[%s3646_s18] sm:$0xff] %v2119_v10 }
 0x259   : > { %v2551_v11 = vpop.f32.mrb[4].mxu1 }
 0x25a   : > { %v1985_v13 = vadd.f32 %v2551_v11, %v3541_v24  ;;  %v1976_v9 = vpop.f32.mrb[5].mxu1 }
 0x25b   : > { %v1977_v28 = vadd.f32 %v3541_v24, %v1976_v9  ;;  %v2552_v14 = vpop.f32.mrb[6].mxu1  ;;  %v2120_v15 = vpop.trf.xlu0 }
 0x25c   : > { %v2033_v50 = vmax.f32 %v1985_v13, 0.0  ;;  %v1988_v17 = vadd.f32 %v2552_v14, %v3541_v24  ;;  %v1979_v18 = vpop.f32.mrb[7].mxu1  ;;  %2169 = vst [vmem:[%s3646_s18 + $0x10] sm:$0xff] %v2120_v15 }
 0x25d   : > { %v2031_v30 = vmax.f32 %v1977_v28, 0.0  ;;  %v1980_v19 = vadd.f32 %v3541_v24, %v1979_v18 }
 0x25e   : > { %2065 = vst.msk [vmem:[#allocation3 + $0xd0] sm:$0xff] %vm1749_vm3, %v2033_v50  ;;  %v2034_v12 = vmax.f32 %v1988_v17, 0.0  ;;  %v2248_v17 = vld [vmem:[%s3740_s4] sm:$0x1] }
 0x25f   : > { %2063 = vst.msk [vmem:[#allocation3 + $0xc0] sm:$0xff] %vm1749_vm3, %v2031_v30  ;;  %v2032_v1 = vmax.f32 %v1980_v19, 0.0  ;;  %v2121_v36 = vpop.trf.xlu0 }
 0x260   : > { %2066 = vst.msk [vmem:[#allocation3 + $0xd8] sm:$0xff] %vm1749_vm3, %v2034_v12  ;;  %2171 = vst [vmem:[%s3646_s18 + $0x20] sm:$0xff] %v2121_v36 }
 0x261   : > { %2064 = vst.msk [vmem:[#allocation3 + $0xc8] sm:$0xff] %vm1749_vm3, %v2032_v1 }
 0x263   : > { %v2122_v50 = vpop.trf.xlu0 }
 0x264   : > { %2173 = vst [vmem:[%s3646_s18 + $0x30] sm:$0xff] %v2122_v50 }
 0x265   : > { %v2097_v46 = vld [vmem:[#allocation3 + $0xd0] sm:$0xff] }
 0x266   : > { %v2095_v21 = vld [vmem:[#allocation3 + $0xc0] sm:$0xff]  ;;  %v2226_v6 = vsel %vm1749_vm3, %v2097_v46, 0.0 }
 0x267   : > { %2143 = vxpose.xlu1.b32.cont [9/16] (narrow) %v2095_v21, 32  ;;  %v2098_v31 = vld [vmem:[#allocation3 + $0xd8] sm:$0xff]  ;;  %v2222_v34 = vsel %vm1749_vm3, %v2095_v21, 0.0 }
 0x268   : > { %v2096_v25 = vld [vmem:[#allocation3 + $0xc8] sm:$0xff]  ;;  %v2223_v37 = vadd.f32 %v2222_v34, %v2221_v54  ;;  %v2228_v57 = vsel %vm1749_vm3, %v2098_v31, 0.0 }
 0x269   : > { %v2224_v39 = vsel %vm1749_vm3, %v2096_v25, 0.0 }
 0x26a   : > { %v2225_v43 = vadd.f32 %v2224_v39, %v2223_v37 }
 0x26b   : > { %2144 = vxpose.xlu1.b32.cont [10/16] (narrow) %v2096_v25, 32 }
 0x26c   : > { %v2227_v55 = vadd.f32 %v2226_v6, %v2225_v43 }
 0x26e   : > { %v2229_v41 = vadd.f32 %v2228_v57, %v2227_v55 }
 0x26f   : > { %2145 = vxpose.xlu1.b32.cont [11/16] (narrow) %v2097_v46, 32 }
 0x273   : > { %2146 = vxpose.xlu1.b32.cont [12/16] (narrow) %v2098_v31, 32 }
 0x276   : > { %v2555_v35 = vpop.f32.mrb[8].mxu1 }
 0x277   : > { %v2001_v38 = vadd.f32 %v2555_v35, %v3541_v24  ;;  %v1992_v2 = vpop.f32.mrb[9].mxu1 }
 0x278   : > { %v1993_v40 = vadd.f32 %v3541_v24, %v1992_v2  ;;  %v2556_v52 = vpop.f32.mrb[10].mxu1 }
 0x279   : > { %v2037_v42 = vmax.f32 %v2001_v38, 0.0  ;;  %v2004_v44 = vadd.f32 %v2556_v52, %v3541_v24  ;;  %v1995_v45 = vpop.f32.mrb[11].mxu1 }
 0x27a   : > { %v2035_v47 = vmax.f32 %v1993_v40, 0.0  ;;  %v1996_v53 = vadd.f32 %v3541_v24, %v1995_v45 }
 0x27b   : > { %2069 = vst.msk [vmem:[#allocation3 + $0xf0] sm:$0xff] %vm1749_vm3, %v2037_v42  ;;  %v2038_v5 = vmax.f32 %v2004_v44, 0.0 }
 0x27c   : > { %2067 = vst.msk [vmem:[#allocation3 + $0xe0] sm:$0xff] %vm1749_vm3, %v2035_v47  ;;  %v2036_v51 = vmax.f32 %v1996_v53, 0.0 }
 0x27d   : > { %2070 = vst.msk [vmem:[#allocation3 + $0xf8] sm:$0xff] %vm1749_vm3, %v2038_v5 }
 0x27e   : > { %2068 = vst.msk [vmem:[#allocation3 + $0xe8] sm:$0xff] %vm1749_vm3, %v2036_v51 }
 0x282   : > { %v2101_v29 = vld [vmem:[#allocation3 + $0xf0] sm:$0xff] }
 0x283   : > { %v2099_v56 = vld [vmem:[#allocation3 + $0xe0] sm:$0xff]  ;;  %v2234_v26 = vsel %vm1749_vm3, %v2101_v29, 0.0 }
 0x284   : > { %2147 = vxpose.xlu1.b32.cont [13/16] (narrow) %v2099_v56, 32  ;;  %v2230_v24 = vsel %vm1749_vm3, %v2099_v56, 0.0  ;;  %v2102_v63 = vld [vmem:[#allocation3 + $0xf8] sm:$0xff] }
 0x285   : > { %v2231_v58 = vadd.f32 %v2230_v24, %v2229_v41  ;;  %v2100_v59 = vld [vmem:[#allocation3 + $0xe8] sm:$0xff]  ;;  %v2236_v4 = vsel %vm1749_vm3, %v2102_v63, 0.0 }
 0x286   : > { %v2232_v61 = vsel %vm1749_vm3, %v2100_v59, 0.0 }
 0x287   : > { %v2233_v62 = vadd.f32 %v2232_v61, %v2231_v58 }
 0x288   : > { %2148 = vxpose.xlu1.b32.cont [14/16] (narrow) %v2100_v59, 32 }
 0x289   : > { %v2235_v0 = vadd.f32 %v2234_v26, %v2233_v62 }
 0x28b   : > { %v2237_v60 = vadd.f32 %v2236_v4, %v2235_v0 }
 0x28c   : > { %2149 = vxpose.xlu1.b32.cont [15/16] (narrow) %v2101_v29, 32 }
 0x28d   : > { %v2238_v49 = vrot.slane %v2237_v60, 4 }
 0x28f   : > { %v2239_v7 = vadd.f32 %v2238_v49, %v2237_v60 }
 0x290   : > { %2150 = vxpose.xlu1.b32.end [16/16] (narrow) %v2102_v63, 32 }
 0x291   : > { %v2240_v8 = vrot.slane %v2239_v7, 2 }
 0x293   : > { %v2241_v10 = vadd.f32 %v2240_v8, %v2239_v7 }
 0x295   : > { %v2242_v11 = vrot.slane %v2241_v10, 1 }
 0x297   : > { %v2243_v13 = vadd.f32 %v2242_v11, %v2241_v10 }
 0x299   : > { %2566 = vmatmul.mubr.msk.f32.vlgmr.msra.gmra.mrb[12].mxu1 %vm1749_vm3, %v2243_v13 }
 0x2d4   : > { %v2151_v9 = vpop.trf.xlu1 }
 0x2d5   : > { %2168 = vst [vmem:[%s3646_s18 + $0x8] sm:$0xff] %v2151_v9 }
 0x2d8   : > { %v2152_v28 = vpop.trf.xlu1 }
 0x2d9   : > { %2170 = vst [vmem:[%s3646_s18 + $0x18] sm:$0xff] %v2152_v28 }
 0x2dc   : > { %v2153_v14 = vpop.trf.xlu1 }
 0x2dd   : > { %2172 = vst [vmem:[%s3646_s18 + $0x28] sm:$0xff] %v2153_v14 }
 0x2e0   : > { %v2154_v15 = vpop.trf.xlu1 }
 0x2e1   : > { %2174 = vst [vmem:[%s3646_s18 + $0x38] sm:$0xff] %v2154_v15 }
 0x36c   : > { %v2318_v18 = vpop.f32.mrb[12].mxu1 }
 0x36d   : > { %v2319_v30 = vadd.f32 %v2318_v18, %v2248_v17  ;;  %v2567_v19 = vpop.f32.mrb[13].mxu1 }
 0x36f   : > { %2323 = vst.msk [vmem:[%s251_s16] sm:$0x1] %vm2322_vm5, %v2319_v30 }
 0x370   : > { %2689 = shalt.err (!%p2686_p3)
}
 0x371   : > { %s2690_s12 = scalar_lea.hbm %s3694_s26, 16  ;;  %s2694_s13 = scalar_lea.hbm %s3742_s6, 32 }
 0x372   : > { %p2691_p4 = scmp.ne.s32.totalorder %s3694_s26, %s2690_s12  ;;  %p2695_p9 = scmp.lt.u32.totalorder %s3694_s26, %s3742_s6 }
 0x373   : > { %p2696_p10 = scmp.lt.u32.totalorder %s2694_s13, %s2690_s12  ;;  %p2698_p12 = scmp.lt.u32.totalorder %s2690_s12, %s3694_s26 }
 0x374   : > { %p2692_p7 = pnand %p2691_p4, %p2826_p5 }
 0x375   : > { %p2697_p11 = por %p2696_p10, %p2695_p9 }
 0x376   : > { %p2693_p8 = pneg %p2692_p7 }
 0x377   : > { %p2699_p13 = por %p2698_p12, %p2697_p11 }
 0x379   : > { %p2700_p0 = pnand %p2699_p13, %p2693_p8 }
 0x37b   : > { %2703 = shalt.err (!%p2700_p0)
}
 0x37c   : > { %2582 = dma.vmem_to_hbm [thread:$0]  (%p2826_p5), %s3696_s17, 16, %s3694_s26, %s2330_s28  }
 0x37d PF: > { %p2588_p1 = scmp.ge.s32.totalorder %s2738_s24, 2  ;;  %s2365_s16 = sand.u32 1, %s2726_s21  }
 0x37e   : > { %s2366_s19 = scalar_lea.sflag [#allocation5], %s2365_s16 }
 0x37f   : > { %p2585_p2 = pnand %p2588_p1, %p2830_p6 }
 0x381   : > { %2721 = dma.done.wait (!%p2585_p2), %s2366_s19, 16  }
 0x382   : > { %2723 = vsyncadd (!%p2585_p2), %s2366_s19, 4294967280  ;;  %p17_p3 = scmp.ge.s32.totalorder %s2813_s27, 4   ;;  %s3751_s21 = smov %s2730_s22 }
 0x383   : > { %s3752_s22 = smov %s2734_s23  ;;  %s3753_s23 = smov %s2824_s30 }
 0x384   : > { %s3754_s24 = smov %s2813_s27  ;;  %19 = sbr.rel (!%p17_p3) target bundleno = 3 (0x3), region = 88 }
 0x38b   :  { %2370 = vsyncpa [#allocation5], 1 }
 0x38c   :  { %2372 = vsyncpa [#allocation5 + $0x1], 1 }

</bundles_post_ra>
